<compile_context>
chip_gen: v5e
topology: v5e:2x2
jax: 0.10.0
libtpu: 0.0.40
codegen_flags: <defaults>
</compile_context>

<pallas_src>
import math

import jax
import jax.numpy as jnp
from jax.experimental import pallas as pl
from jax.experimental.pallas import tpu as pltpu


NEG_INF = -1e9
VMEM_LIMIT = 48 * 1024 * 1024   # explicit scoped-VMEM limit, headroom under 64 MiB


# ----------------------------------------------------------------------------
# Pallas kernels
# ----------------------------------------------------------------------------
def _layer_body(x_ref, bias_ref,
                wqkv_ref, bqkv_ref, wo_ref, bo_ref,
                ln1g_ref, ln1b_ref, w1_ref, b1_ref, w2_ref, b2_ref,
                ln2g_ref, ln2b_ref,
                out_ref, attn_ref, *, n_heads):
    """One full Transformer decoder layer for one batch element.

    x_ref    : (1, S, D)   f32 input activations
    bias_ref : (1, S, S)   f32 additive attention mask (0 or -1e9)
    out_ref  : (1, S, D)   f32 layer output
    attn_ref : (1, H, S, S) f32 attention weights (None on non-final layers)
    """
    x = x_ref[0]                                  # (S, D) f32
    S, D = x.shape
    H = n_heads
    dk = D // H
    scale = 1.0 / math.sqrt(dk)

    # ---- fused QKV projection: one (S,D)x(D,3D) bf16 matmul, f32 accumulate ----
    qkv = jnp.dot(x.astype(jnp.bfloat16), wqkv_ref[...],
                  preferred_element_type=jnp.float32) + bqkv_ref[...]
    q, k, v = qkv[:, :D], qkv[:, D:2 * D], qkv[:, 2 * D:]

    def split_heads(t):
        # (S, D) -> (H, S, dk); static unrolled lane slices, no per-head compute.
        return jnp.stack([t[:, h * dk:(h + 1) * dk] for h in range(H)], axis=0)

    qh = split_heads(q).astype(jnp.bfloat16)
    kh = split_heads(k).astype(jnp.bfloat16)
    vh = split_heads(v).astype(jnp.bfloat16)

    # ---- batched attention scores over all heads: (H,S,dk)x(H,S,dk)->(H,S,S) ----
    scores = jax.lax.dot_general(
        qh, kh,
        dimension_numbers=(((2,), (2,)), ((0,), (0,))),
        preferred_element_type=jnp.float32) * scale           # (H, S, S) f32
    scores = scores + bias_ref[...]                           # additive mask (1,S,S)

    # ---- single masked softmax over all heads (f32) ----
    m = jnp.max(scores, axis=-1, keepdims=True)
    e = jnp.exp(scores - m)
    denom = jnp.sum(e, axis=-1, keepdims=True)
    w = e * pl.reciprocal(denom, approx=True)                 # (H, S, S) f32

    if attn_ref is not None:                                  # last layer only
        attn_ref[0] = w

    # ---- batched context: (H,S,S)x(H,S,dk)->(H,S,dk) ----
    ctx = jax.lax.dot_general(
        w.astype(jnp.bfloat16), vh,
        dimension_numbers=(((2,), (1,)), ((0,), (0,))),
        preferred_element_type=jnp.float32)                   # (H, S, dk) f32

    attn_cat = jnp.concatenate([ctx[h] for h in range(H)], axis=-1)   # (S, D)
    attn_out = jnp.dot(attn_cat.astype(jnp.bfloat16), wo_ref[...],
                       preferred_element_type=jnp.float32) + bo_ref[...]

    # ---- residual + LayerNorm 1 (eps=1e-5, biased variance, matches nn.LayerNorm) ----
    h1 = x + attn_out
    mu = jnp.mean(h1, axis=-1, keepdims=True)
    var = jnp.mean((h1 - mu) ** 2, axis=-1, keepdims=True)
    h1n = (h1 - mu) * jax.lax.rsqrt(var + 1e-5) * ln1g_ref[...] + ln1b_ref[...]

    # ---- position-wise FFN (bf16 MXU inputs, f32 accumulate, f32 elementwise) ----
    f = jnp.dot(h1n.astype(jnp.bfloat16), w1_ref[...],
                preferred_element_type=jnp.float32) + b1_ref[...]
    f = jnp.maximum(f, 0.0)
    f = jnp.dot(f.astype(jnp.bfloat16), w2_ref[...],
                preferred_element_type=jnp.float32) + b2_ref[...]

    # ---- residual + LayerNorm 2 ----
    h2 = h1n + f
    mu2 = jnp.mean(h2, axis=-1, keepdims=True)
    var2 = jnp.mean((h2 - mu2) ** 2, axis=-1, keepdims=True)
    out = (h2 - mu2) * jax.lax.rsqrt(var2 + 1e-5) * ln2g_ref[...] + ln2b_ref[...]
    out_ref[0] = out


def _make_layer_kernel(n_heads, store_attn):
    if store_attn:
        def kernel(x_ref, bias_ref, wqkv_ref, bqkv_ref, wo_ref, bo_ref,
                   ln1g_ref, ln1b_ref, w1_ref, b1_ref, w2_ref, b2_ref,
                   ln2g_ref, ln2b_ref, out_ref, attn_ref):
            _layer_body(x_ref, bias_ref, wqkv_ref, bqkv_ref, wo_ref, bo_ref,
                        ln1g_ref, ln1b_ref, w1_ref, b1_ref, w2_ref, b2_ref,
                        ln2g_ref, ln2b_ref, out_ref, attn_ref, n_heads=n_heads)
    else:
        def kernel(x_ref, bias_ref, wqkv_ref, bqkv_ref, wo_ref, bo_ref,
                   ln1g_ref, ln1b_ref, w1_ref, b1_ref, w2_ref, b2_ref,
                   ln2g_ref, ln2b_ref, out_ref):
            _layer_body(x_ref, bias_ref, wqkv_ref, bqkv_ref, wo_ref, bo_ref,
                        ln1g_ref, ln1b_ref, w1_ref, b1_ref, w2_ref, b2_ref,
                        ln2g_ref, ln2b_ref, out_ref, None, n_heads=n_heads)
    return kernel


def final_proj_kernel(x_ref, w_ref, b_ref, out_ref):
    """Final linear projection to vocabulary, one batch element per program."""
    out_ref[0] = (jnp.dot(x_ref[0].astype(jnp.bfloat16), w_ref[...],
                          preferred_element_type=jnp.float32) + b_ref[...])


# ----------------------------------------------------------------------------
# Wrappers around pallas_call
# ----------------------------------------------------------------------------
def run_decoder_layer(x, bias, params, n_heads, *, store_attn):
    B, S, D = x.shape
    H = n_heads
    F = params["w1"].shape[1]

    full = lambda shape: pl.BlockSpec(shape, lambda b: (0,) * len(shape))

    in_specs = [
        pl.BlockSpec((1, S, D), lambda b: (b, 0, 0)),   # x
        pl.BlockSpec((1, S, S), lambda b: (b, 0, 0)),   # additive mask bias
        full((D, 3 * D)), full((1, 3 * D)),             # fused wqkv, bqkv
        full((D, D)), full((1, D)),                     # wo, bo
        full((1, D)), full((1, D)),                     # ln1 gamma, beta
        full((D, F)), full((1, F)),                     # w1, b1
        full((F, D)), full((1, D)),                     # w2, b2
        full((1, D)), full((1, D)),                     # ln2 gamma, beta
    ]

    if store_attn:
        out_specs = (
            pl.BlockSpec((1, S, D), lambda b: (b, 0, 0)),
            pl.BlockSpec((1, H, S, S), lambda b: (b, 0, 0, 0)),
        )
        out_shape = (
            jax.ShapeDtypeStruct((B, S, D), jnp.float32),
            jax.ShapeDtypeStruct((B, H, S, S), jnp.float32),
        )
    else:
        out_specs = pl.BlockSpec((1, S, D), lambda b: (b, 0, 0))
        out_shape = jax.ShapeDtypeStruct((B, S, D), jnp.float32)

    kernel = _make_layer_kernel(n_heads, store_attn)
    return pl.pallas_call(
        kernel,
        grid=(B,),
        in_specs=in_specs,
        out_specs=out_specs,
        out_shape=out_shape,
        compiler_params=pltpu.CompilerParams(
            dimension_semantics=("parallel",),
            vmem_limit_bytes=VMEM_LIMIT),
    )(x, bias,
      params["wqkv"], params["bqkv"], params["wo"], params["bo"],
      params["ln1_g"], params["ln1_b"],
      params["w1"], params["b1"], params["w2"], params["b2"],
      params["ln2_g"], params["ln2_b"])


def run_final_proj(x, w, b):
    B, S, D = x.shape
    V = w.shape[1]
    return pl.pallas_call(
        final_proj_kernel,
        grid=(B,),
        in_specs=[
            pl.BlockSpec((1, S, D), lambda bb: (bb, 0, 0)),
            pl.BlockSpec((D, V), lambda bb: (0, 0)),
            pl.BlockSpec((1, V), lambda bb: (0, 0)),
        ],
        out_specs=pl.BlockSpec((1, S, V), lambda bb: (bb, 0, 0)),
        out_shape=jax.ShapeDtypeStruct((B, S, V), jnp.float32),
        compiler_params=pltpu.CompilerParams(
            dimension_semantics=("parallel",),
            vmem_limit_bytes=VMEM_LIMIT),
    )(x, w, b)


# ----------------------------------------------------------------------------
# Model glue (embedding, positional encoding, masks) in plain JAX
# ----------------------------------------------------------------------------
def positional_encoding(max_len, d_model):
    position = jnp.arange(max_len, dtype=jnp.float32)[:, None]
    div_term = jnp.exp(jnp.arange(0, d_model, 2, dtype=jnp.float32)
                       * -(math.log(10000.0) / d_model))
    pe = jnp.zeros((max_len, d_model), jnp.float32)
    pe = pe.at[:, 0::2].set(jnp.sin(position * div_term))
    pe = pe.at[:, 1::2].set(jnp.cos(position * div_term))
    return pe


def build_params(key, vocab_size, d_model, ff_dim, n_layers):
    keys = jax.random.split(key, 2 + n_layers)
    s = 0.02
    params = {
        "embedding": jax.random.normal(keys[0], (vocab_size, d_model),
                                       jnp.float32) * s,
        # bf16 MXU weights (halve weight DMA bytes), f32 biases.
        "fc_w": (jax.random.normal(keys[1], (d_model, vocab_size),
                                   jnp.float32) * s).astype(jnp.bfloat16),
        "fc_b": jnp.zeros((1, vocab_size), jnp.float32),
    }

    layers = []
    for l in range(n_layers):
        lk = jax.random.split(keys[2 + l], 6)
        wq = jax.random.normal(lk[0], (d_model, d_model), jnp.float32) * s
        wk = jax.random.normal(lk[1], (d_model, d_model), jnp.float32) * s
        wv = jax.random.normal(lk[2], (d_model, d_model), jnp.float32) * s
        layers.append({
            "wqkv": jnp.concatenate([wq, wk, wv], axis=1).astype(jnp.bfloat16),
            "bqkv": jnp.zeros((1, 3 * d_model), jnp.float32),
            "wo": (jax.random.normal(lk[3], (d_model, d_model),
                                     jnp.float32) * s).astype(jnp.bfloat16),
            "bo": jnp.zeros((1, d_model), jnp.float32),
            "ln1_g": jnp.ones((1, d_model), jnp.float32),
            "ln1_b": jnp.zeros((1, d_model), jnp.float32),
            "w1": (jax.random.normal(lk[4], (d_model, ff_dim),
                                     jnp.float32) * s).astype(jnp.bfloat16),
            "b1": jnp.zeros((1, ff_dim), jnp.float32),
            "w2": (jax.random.normal(lk[5], (ff_dim, d_model),
                                     jnp.float32) * s).astype(jnp.bfloat16),
            "b2": jnp.zeros((1, d_model), jnp.float32),
            "ln2_g": jnp.ones((1, d_model), jnp.float32),
            "ln2_b": jnp.zeros((1, d_model), jnp.float32),
        })
    params["layers"] = layers
    return params


def decoder_only_transformer(tokens, params, *, pad_index, n_heads, d_model,
                             max_seq_len):
    """tokens: (B, S) int32.  Returns (logits (B,S,V), attn (B,H,S,S))."""
    B, S = tokens.shape

    # Embedding * sqrt(d_model) + positional encoding (glue, plain JAX).
    emb = jnp.take(params["embedding"], tokens, axis=0) * math.sqrt(d_model)
    pe = positional_encoding(max_seq_len, d_model)
    x = emb + pe[None, :S, :]

    # Attention mask: padding & causal, pre-computed once as an additive bias.
    pad_mask = (tokens != pad_index)[:, None, :]                  # (B, 1, S)
    causal = jnp.tril(jnp.ones((S, S), dtype=bool))[None]         # (1, S, S)
    keep = pad_mask & causal                                      # (B, S, S)
    bias = jnp.where(keep, 0.0, NEG_INF).astype(jnp.float32)      # additive

    n_layers = len(params["layers"])
    attention = None
    for i, lp in enumerate(params["layers"]):
        last = (i == n_layers - 1)
        if last:
            # Only the last layer's attention weights are returned by the
            # reference module, so only the last layer writes them to HBM.
            x, attention = run_decoder_layer(x, bias, lp, n_heads,
                                             store_attn=True)
        else:
            x = run_decoder_layer(x, bias, lp, n_heads, store_attn=False)

    logits = run_final_proj(x, params["fc_w"], params["fc_b"])
    return logits, attention


# ----------------------------------------------------------------------------
if __name__ == "__main__":
    # Small, deterministic configuration; dims chosen as multiples of 128 where
    # it matters for lane-dense stores (d_model, ff_dim, vocab).
    pad_index = 0
    vocab_size = 256
    d_model = 128
    max_seq_len = 32
    n_heads = 4
    n_layers = 2
    ff_dim = 256
    batch = 2
    seq = 16

    key = jax.random.PRNGKey(0)
    pkey, tkey = jax.random.split(key)
    params = build_params(pkey, vocab_size, d_model, ff_dim, n_layers)

    tokens = jax.random.randint(tkey, (batch, seq), 1, vocab_size,
                                dtype=jnp.int32)
    # Put some padding tokens at the end of the second sequence.
    tokens = tokens.at[1, -2:].set(pad_index)

    logits, attention = decoder_only_transformer(
        tokens, params, pad_index=pad_index, n_heads=n_heads,
        d_model=d_model, max_seq_len=max_seq_len)

    jax.block_until_ready((logits, attention))
    assert logits.shape == (batch, seq, vocab_size)
    assert attention.shape == (batch, n_heads, seq, seq)
    assert bool(jnp.all(jnp.isfinite(logits)))
    assert bool(jnp.all(jnp.isfinite(attention)))
    print("KERNEL_OK")
</pallas_src>

<mosaic_0001>
module attributes {stable_mosaic.version = 11 : i64} {
  func.func @kernel(%arg0: i32, %arg1: memref<1x16x128xf32, #tpu.memory_space<vmem>>, %arg2: memref<1x16x16xf32, #tpu.memory_space<vmem>>, %arg3: memref<128x384xbf16, #tpu.memory_space<vmem>>, %arg4: memref<1x384xf32, #tpu.memory_space<vmem>>, %arg5: memref<128x128xbf16, #tpu.memory_space<vmem>>, %arg6: memref<1x128xf32, #tpu.memory_space<vmem>>, %arg7: memref<1x128xf32, #tpu.memory_space<vmem>>, %arg8: memref<1x128xf32, #tpu.memory_space<vmem>>, %arg9: memref<128x256xbf16, #tpu.memory_space<vmem>>, %arg10: memref<1x256xf32, #tpu.memory_space<vmem>>, %arg11: memref<256x128xbf16, #tpu.memory_space<vmem>>, %arg12: memref<1x128xf32, #tpu.memory_space<vmem>>, %arg13: memref<1x128xf32, #tpu.memory_space<vmem>>, %arg14: memref<1x128xf32, #tpu.memory_space<vmem>>, %arg15: memref<1x16x128xf32, #tpu.memory_space<vmem>>) attributes {dimension_semantics = [#tpu.dimension_semantics<parallel>], iteration_bounds = array<i64: 2>, scalar_prefetch = 0 : i64, scratch_operands = 0 : i64, tpu.core_type = #tpu.core_type<tc>, window_params = [{transform_indices = @transform_0, window_bounds = array<i64: 1, 16, 128>}, {transform_indices = @transform_1, window_bounds = array<i64: 1, 16, 16>}, {pipeline_mode = #tpu.pipeline_mode<synchronous>, transform_indices = @transform_2, window_bounds = array<i64: 128, 384>}, {pipeline_mode = #tpu.pipeline_mode<synchronous>, transform_indices = @transform_3, window_bounds = array<i64: 1, 384>}, {pipeline_mode = #tpu.pipeline_mode<synchronous>, transform_indices = @transform_4, window_bounds = array<i64: 128, 128>}, {pipeline_mode = #tpu.pipeline_mode<synchronous>, transform_indices = @transform_5, window_bounds = array<i64: 1, 128>}, {pipeline_mode = #tpu.pipeline_mode<synchronous>, transform_indices = @transform_6, window_bounds = array<i64: 1, 128>}, {pipeline_mode = #tpu.pipeline_mode<synchronous>, transform_indices = @transform_7, window_bounds = array<i64: 1, 128>}, {pipeline_mode = #tpu.pipeline_mode<synchronous>, transform_indices = @transform_8, window_bounds = array<i64: 128, 256>}, {pipeline_mode = #tpu.pipeline_mode<synchronous>, transform_indices = @transform_9, window_bounds = array<i64: 1, 256>}, {pipeline_mode = #tpu.pipeline_mode<synchronous>, transform_indices = @transform_10, window_bounds = array<i64: 256, 128>}, {pipeline_mode = #tpu.pipeline_mode<synchronous>, transform_indices = @transform_11, window_bounds = array<i64: 1, 128>}, {pipeline_mode = #tpu.pipeline_mode<synchronous>, transform_indices = @transform_12, window_bounds = array<i64: 1, 128>}, {pipeline_mode = #tpu.pipeline_mode<synchronous>, transform_indices = @transform_13, window_bounds = array<i64: 1, 128>}, {transform_indices = @transform_14, window_bounds = array<i64: 1, 16, 128>}]} {
    %c0 = arith.constant 0 : index
    %c0_0 = arith.constant 0 : index
    %c0_1 = arith.constant 0 : index
    %0 = vector.load %arg1[%c0, %c0_0, %c0_1] : memref<1x16x128xf32, #tpu.memory_space<vmem>>, vector<1x16x128xf32>
    %1 = vector.shape_cast %0 : vector<1x16x128xf32> to vector<16x128xf32>
    %2 = arith.truncf %1 : vector<16x128xf32> to vector<16x128xbf16>
    %c0_2 = arith.constant 0 : index
    %c0_3 = arith.constant 0 : index
    %3 = vector.load %arg3[%c0_2, %c0_3] : memref<128x384xbf16, #tpu.memory_space<vmem>>, vector<128x384xbf16>
    %cst = arith.constant dense<0.000000e+00> : vector<16x384xf32>
    %4 = tpu.matmul %2, %3, %cst {dimension_numbers = #tpu.dot_dimension_numbers<[1], [0], [0], [1], [0, 0, 1, 1], [], []>} : vector<16x128xbf16>, vector<128x384xbf16>, vector<16x384xf32> -> vector<16x384xf32>
    %c0_4 = arith.constant 0 : index
    %c0_5 = arith.constant 0 : index
    %5 = vector.load %arg4[%c0_4, %c0_5] : memref<1x384xf32, #tpu.memory_space<vmem>>, vector<1x384xf32>
    %6 = vector.broadcast %5 : vector<1x384xf32> to vector<16x384xf32>
    %7 = arith.addf %4, %6 : vector<16x384xf32>
    %8 = vector.extract_strided_slice %7 {offsets = [0, 0], sizes = [16, 128], strides = [1, 1]} : vector<16x384xf32> to vector<16x128xf32>
    %9 = vector.extract_strided_slice %7 {offsets = [0, 128], sizes = [16, 128], strides = [1, 1]} : vector<16x384xf32> to vector<16x128xf32>
    %10 = vector.extract_strided_slice %7 {offsets = [0, 256], sizes = [16, 128], strides = [1, 1]} : vector<16x384xf32> to vector<16x128xf32>
    %11 = vector.extract_strided_slice %8 {offsets = [0, 0], sizes = [16, 32], strides = [1, 1]} : vector<16x128xf32> to vector<16x32xf32>
    %12 = vector.extract_strided_slice %8 {offsets = [0, 32], sizes = [16, 32], strides = [1, 1]} : vector<16x128xf32> to vector<16x32xf32>
    %13 = vector.extract_strided_slice %8 {offsets = [0, 64], sizes = [16, 32], strides = [1, 1]} : vector<16x128xf32> to vector<16x32xf32>
    %14 = vector.extract_strided_slice %8 {offsets = [0, 96], sizes = [16, 32], strides = [1, 1]} : vector<16x128xf32> to vector<16x32xf32>
    %15 = vector.shape_cast %11 : vector<16x32xf32> to vector<1x16x32xf32>
    %16 = vector.shape_cast %12 : vector<16x32xf32> to vector<1x16x32xf32>
    %17 = vector.shape_cast %13 : vector<16x32xf32> to vector<1x16x32xf32>
    %18 = vector.shape_cast %14 : vector<16x32xf32> to vector<1x16x32xf32>
    %19 = tpu.concatenate %15, %16, %17, %18 in 0 : vector<1x16x32xf32>, vector<1x16x32xf32>, vector<1x16x32xf32>, vector<1x16x32xf32> -> vector<4x16x32xf32>
    %20 = arith.truncf %19 : vector<4x16x32xf32> to vector<4x16x32xbf16>
    %21 = vector.extract_strided_slice %9 {offsets = [0, 0], sizes = [16, 32], strides = [1, 1]} : vector<16x128xf32> to vector<16x32xf32>
    %22 = vector.extract_strided_slice %9 {offsets = [0, 32], sizes = [16, 32], strides = [1, 1]} : vector<16x128xf32> to vector<16x32xf32>
    %23 = vector.extract_strided_slice %9 {offsets = [0, 64], sizes = [16, 32], strides = [1, 1]} : vector<16x128xf32> to vector<16x32xf32>
    %24 = vector.extract_strided_slice %9 {offsets = [0, 96], sizes = [16, 32], strides = [1, 1]} : vector<16x128xf32> to vector<16x32xf32>
    %25 = vector.shape_cast %21 : vector<16x32xf32> to vector<1x16x32xf32>
    %26 = vector.shape_cast %22 : vector<16x32xf32> to vector<1x16x32xf32>
    %27 = vector.shape_cast %23 : vector<16x32xf32> to vector<1x16x32xf32>
    %28 = vector.shape_cast %24 : vector<16x32xf32> to vector<1x16x32xf32>
    %29 = tpu.concatenate %25, %26, %27, %28 in 0 : vector<1x16x32xf32>, vector<1x16x32xf32>, vector<1x16x32xf32>, vector<1x16x32xf32> -> vector<4x16x32xf32>
    %30 = arith.truncf %29 : vector<4x16x32xf32> to vector<4x16x32xbf16>
    %31 = vector.extract_strided_slice %10 {offsets = [0, 0], sizes = [16, 32], strides = [1, 1]} : vector<16x128xf32> to vector<16x32xf32>
    %32 = vector.extract_strided_slice %10 {offsets = [0, 32], sizes = [16, 32], strides = [1, 1]} : vector<16x128xf32> to vector<16x32xf32>
    %33 = vector.extract_strided_slice %10 {offsets = [0, 64], sizes = [16, 32], strides = [1, 1]} : vector<16x128xf32> to vector<16x32xf32>
    %34 = vector.extract_strided_slice %10 {offsets = [0, 96], sizes = [16, 32], strides = [1, 1]} : vector<16x128xf32> to vector<16x32xf32>
    %35 = vector.shape_cast %31 : vector<16x32xf32> to vector<1x16x32xf32>
    %36 = vector.shape_cast %32 : vector<16x32xf32> to vector<1x16x32xf32>
    %37 = vector.shape_cast %33 : vector<16x32xf32> to vector<1x16x32xf32>
    %38 = vector.shape_cast %34 : vector<16x32xf32> to vector<1x16x32xf32>
    %39 = tpu.concatenate %35, %36, %37, %38 in 0 : vector<1x16x32xf32>, vector<1x16x32xf32>, vector<1x16x32xf32>, vector<1x16x32xf32> -> vector<4x16x32xf32>
    %40 = arith.truncf %39 : vector<4x16x32xf32> to vector<4x16x32xbf16>
    %cst_6 = arith.constant dense<0.000000e+00> : vector<4x16x16xf32>
    %41 = tpu.matmul %20, %30, %cst_6 {dimension_numbers = #tpu.dot_dimension_numbers<[2], [2], [1], [1], [0, 0, 0, 1, 1, 1], [0], [0]>} : vector<4x16x32xbf16>, vector<4x16x32xbf16>, vector<4x16x16xf32> -> vector<4x16x16xf32>
    %cst_7 = arith.constant 0.176776692 : f32
    %42 = vector.broadcast %cst_7 : f32 to vector<4x16x16xf32>
    %43 = arith.mulf %41, %42 : vector<4x16x16xf32>
    %c0_8 = arith.constant 0 : index
    %c0_9 = arith.constant 0 : index
    %c0_10 = arith.constant 0 : index
    %44 = vector.load %arg2[%c0_8, %c0_9, %c0_10] : memref<1x16x16xf32, #tpu.memory_space<vmem>>, vector<1x16x16xf32>
    %45 = vector.broadcast %44 : vector<1x16x16xf32> to vector<4x16x16xf32>
    %46 = arith.addf %43, %45 : vector<4x16x16xf32>
    %cst_11 = arith.constant dense<0xFF800000> : vector<4x16xf32>
    %47 = vector.multi_reduction <maximumf>, %46, %cst_11 [2] : vector<4x16x16xf32> to vector<4x16xf32>
    %48 = vector.shape_cast %47 : vector<4x16xf32> to vector<4x16x1xf32>
    %49 = vector.broadcast %48 : vector<4x16x1xf32> to vector<4x16x16xf32>
    %50 = arith.subf %46, %49 : vector<4x16x16xf32>
    %51 = math.exp %50 : vector<4x16x16xf32>
    %cst_12 = arith.constant dense<0.000000e+00> : vector<4x16xf32>
    %52 = vector.multi_reduction <add>, %51, %cst_12 [2] : vector<4x16x16xf32> to vector<4x16xf32>
    %53 = vector.shape_cast %52 : vector<4x16xf32> to vector<4x16x1xf32>
    %54 = tpu.reciprocal %53 {approx = true} : vector<4x16x1xf32> -> vector<4x16x1xf32>
    %55 = vector.broadcast %54 : vector<4x16x1xf32> to vector<4x16x16xf32>
    %56 = arith.mulf %51, %55 : vector<4x16x16xf32>
    %57 = arith.truncf %56 : vector<4x16x16xf32> to vector<4x16x16xbf16>
    %cst_13 = arith.constant dense<0.000000e+00> : vector<4x16x32xf32>
    %58 = tpu.matmul %57, %40, %cst_13 {dimension_numbers = #tpu.dot_dimension_numbers<[2], [1], [1], [2], [0, 0, 0, 1, 1, 2], [0], [0]>} : vector<4x16x16xbf16>, vector<4x16x32xbf16>, vector<4x16x32xf32> -> vector<4x16x32xf32>
    %59 = vector.extract_strided_slice %58 {offsets = [0, 0, 0], sizes = [1, 16, 32], strides = [1, 1, 1]} : vector<4x16x32xf32> to vector<1x16x32xf32>
    %60 = vector.shape_cast %59 : vector<1x16x32xf32> to vector<16x32xf32>
    %61 = vector.extract_strided_slice %58 {offsets = [1, 0, 0], sizes = [1, 16, 32], strides = [1, 1, 1]} : vector<4x16x32xf32> to vector<1x16x32xf32>
    %62 = vector.shape_cast %61 : vector<1x16x32xf32> to vector<16x32xf32>
    %63 = vector.extract_strided_slice %58 {offsets = [2, 0, 0], sizes = [1, 16, 32], strides = [1, 1, 1]} : vector<4x16x32xf32> to vector<1x16x32xf32>
    %64 = vector.shape_cast %63 : vector<1x16x32xf32> to vector<16x32xf32>
    %65 = vector.extract_strided_slice %58 {offsets = [3, 0, 0], sizes = [1, 16, 32], strides = [1, 1, 1]} : vector<4x16x32xf32> to vector<1x16x32xf32>
    %66 = vector.shape_cast %65 : vector<1x16x32xf32> to vector<16x32xf32>
    %67 = tpu.concatenate %60, %62, %64, %66 in 1 : vector<16x32xf32>, vector<16x32xf32>, vector<16x32xf32>, vector<16x32xf32> -> vector<16x128xf32>
    %68 = arith.truncf %67 : vector<16x128xf32> to vector<16x128xbf16>
    %c0_14 = arith.constant 0 : index
    %c0_15 = arith.constant 0 : index
    %69 = vector.load %arg5[%c0_14, %c0_15] : memref<128x128xbf16, #tpu.memory_space<vmem>>, vector<128x128xbf16>
    %cst_16 = arith.constant dense<0.000000e+00> : vector<16x128xf32>
    %70 = tpu.matmul %68, %69, %cst_16 {dimension_numbers = #tpu.dot_dimension_numbers<[1], [0], [0], [1], [0, 0, 1, 1], [], []>} : vector<16x128xbf16>, vector<128x128xbf16>, vector<16x128xf32> -> vector<16x128xf32>
    %c0_17 = arith.constant 0 : index
    %c0_18 = arith.constant 0 : index
    %71 = vector.load %arg6[%c0_17, %c0_18] : memref<1x128xf32, #tpu.memory_space<vmem>>, vector<1x128xf32>
    %72 = vector.broadcast %71 : vector<1x128xf32> to vector<16x128xf32>
    %73 = arith.addf %70, %72 : vector<16x128xf32>
    %74 = arith.addf %1, %73 : vector<16x128xf32>
    %cst_19 = arith.constant dense<0.000000e+00> : vector<16xf32>
    %75 = vector.multi_reduction <add>, %74, %cst_19 [1] : vector<16x128xf32> to vector<16xf32>
    %76 = vector.shape_cast %75 : vector<16xf32> to vector<16x1xf32>
    %cst_20 = arith.constant 1.280000e+02 : f32
    %77 = vector.broadcast %cst_20 : f32 to vector<16x1xf32>
    %78 = arith.divf %76, %77 : vector<16x1xf32>
    %79 = vector.broadcast %78 : vector<16x1xf32> to vector<16x128xf32>
    %80 = arith.subf %74, %79 : vector<16x128xf32>
    %81 = arith.mulf %80, %80 : vector<16x128xf32>
    %cst_21 = arith.constant dense<0.000000e+00> : vector<16xf32>
    %82 = vector.multi_reduction <add>, %81, %cst_21 [1] : vector<16x128xf32> to vector<16xf32>
    %83 = vector.shape_cast %82 : vector<16xf32> to vector<16x1xf32>
    %cst_22 = arith.constant 1.280000e+02 : f32
    %84 = vector.broadcast %cst_22 : f32 to vector<16x1xf32>
    %85 = arith.divf %83, %84 : vector<16x1xf32>
    %86 = vector.broadcast %78 : vector<16x1xf32> to vector<16x128xf32>
    %87 = arith.subf %74, %86 : vector<16x128xf32>
    %cst_23 = arith.constant 9.99999974E-6 : f32
    %88 = vector.broadcast %cst_23 : f32 to vector<16x1xf32>
    %89 = arith.addf %85, %88 : vector<16x1xf32>
    %90 = math.rsqrt %89 : vector<16x1xf32>
    %91 = vector.broadcast %90 : vector<16x1xf32> to vector<16x128xf32>
    %92 = arith.mulf %87, %91 : vector<16x128xf32>
    %c0_24 = arith.constant 0 : index
    %c0_25 = arith.constant 0 : index
    %93 = vector.load %arg7[%c0_24, %c0_25] : memref<1x128xf32, #tpu.memory_space<vmem>>, vector<1x128xf32>
    %94 = vector.broadcast %93 : vector<1x128xf32> to vector<16x128xf32>
    %95 = arith.mulf %92, %94 : vector<16x128xf32>
    %c0_26 = arith.constant 0 : index
    %c0_27 = arith.constant 0 : index
    %96 = vector.load %arg8[%c0_26, %c0_27] : memref<1x128xf32, #tpu.memory_space<vmem>>, vector<1x128xf32>
    %97 = vector.broadcast %96 : vector<1x128xf32> to vector<16x128xf32>
    %98 = arith.addf %95, %97 : vector<16x128xf32>
    %99 = arith.truncf %98 : vector<16x128xf32> to vector<16x128xbf16>
    %c0_28 = arith.constant 0 : index
    %c0_29 = arith.constant 0 : index
    %100 = vector.load %arg9[%c0_28, %c0_29] : memref<128x256xbf16, #tpu.memory_space<vmem>>, vector<128x256xbf16>
    %cst_30 = arith.constant dense<0.000000e+00> : vector<16x256xf32>
    %101 = tpu.matmul %99, %100, %cst_30 {dimension_numbers = #tpu.dot_dimension_numbers<[1], [0], [0], [1], [0, 0, 1, 1], [], []>} : vector<16x128xbf16>, vector<128x256xbf16>, vector<16x256xf32> -> vector<16x256xf32>
    %c0_31 = arith.constant 0 : index
    %c0_32 = arith.constant 0 : index
    %102 = vector.load %arg10[%c0_31, %c0_32] : memref<1x256xf32, #tpu.memory_space<vmem>>, vector<1x256xf32>
    %103 = vector.broadcast %102 : vector<1x256xf32> to vector<16x256xf32>
    %104 = arith.addf %101, %103 : vector<16x256xf32>
    %cst_33 = arith.constant 0.000000e+00 : f32
    %105 = vector.broadcast %cst_33 : f32 to vector<16x256xf32>
    %106 = arith.maximumf %104, %105 : vector<16x256xf32>
    %107 = arith.truncf %106 : vector<16x256xf32> to vector<16x256xbf16>
    %c0_34 = arith.constant 0 : index
    %c0_35 = arith.constant 0 : index
    %108 = vector.load %arg11[%c0_34, %c0_35] : memref<256x128xbf16, #tpu.memory_space<vmem>>, vector<256x128xbf16>
    %cst_36 = arith.constant dense<0.000000e+00> : vector<16x128xf32>
    %109 = tpu.matmul %107, %108, %cst_36 {dimension_numbers = #tpu.dot_dimension_numbers<[1], [0], [0], [1], [0, 0, 1, 1], [], []>} : vector<16x256xbf16>, vector<256x128xbf16>, vector<16x128xf32> -> vector<16x128xf32>
    %c0_37 = arith.constant 0 : index
    %c0_38 = arith.constant 0 : index
    %110 = vector.load %arg12[%c0_37, %c0_38] : memref<1x128xf32, #tpu.memory_space<vmem>>, vector<1x128xf32>
    %111 = vector.broadcast %110 : vector<1x128xf32> to vector<16x128xf32>
    %112 = arith.addf %109, %111 : vector<16x128xf32>
    %113 = arith.addf %98, %112 : vector<16x128xf32>
    %cst_39 = arith.constant dense<0.000000e+00> : vector<16xf32>
    %114 = vector.multi_reduction <add>, %113, %cst_39 [1] : vector<16x128xf32> to vector<16xf32>
    %115 = vector.shape_cast %114 : vector<16xf32> to vector<16x1xf32>
    %cst_40 = arith.constant 1.280000e+02 : f32
    %116 = vector.broadcast %cst_40 : f32 to vector<16x1xf32>
    %117 = arith.divf %115, %116 : vector<16x1xf32>
    %118 = vector.broadcast %117 : vector<16x1xf32> to vector<16x128xf32>
    %119 = arith.subf %113, %118 : vector<16x128xf32>
    %120 = arith.mulf %119, %119 : vector<16x128xf32>
    %cst_41 = arith.constant dense<0.000000e+00> : vector<16xf32>
    %121 = vector.multi_reduction <add>, %120, %cst_41 [1] : vector<16x128xf32> to vector<16xf32>
    %122 = vector.shape_cast %121 : vector<16xf32> to vector<16x1xf32>
    %cst_42 = arith.constant 1.280000e+02 : f32
    %123 = vector.broadcast %cst_42 : f32 to vector<16x1xf32>
    %124 = arith.divf %122, %123 : vector<16x1xf32>
    %125 = vector.broadcast %117 : vector<16x1xf32> to vector<16x128xf32>
    %126 = arith.subf %113, %125 : vector<16x128xf32>
    %cst_43 = arith.constant 9.99999974E-6 : f32
    %127 = vector.broadcast %cst_43 : f32 to vector<16x1xf32>
    %128 = arith.addf %124, %127 : vector<16x1xf32>
    %129 = math.rsqrt %128 : vector<16x1xf32>
    %130 = vector.broadcast %129 : vector<16x1xf32> to vector<16x128xf32>
    %131 = arith.mulf %126, %130 : vector<16x128xf32>
    %c0_44 = arith.constant 0 : index
    %c0_45 = arith.constant 0 : index
    %132 = vector.load %arg13[%c0_44, %c0_45] : memref<1x128xf32, #tpu.memory_space<vmem>>, vector<1x128xf32>
    %133 = vector.broadcast %132 : vector<1x128xf32> to vector<16x128xf32>
    %134 = arith.mulf %131, %133 : vector<16x128xf32>
    %c0_46 = arith.constant 0 : index
    %c0_47 = arith.constant 0 : index
    %135 = vector.load %arg14[%c0_46, %c0_47] : memref<1x128xf32, #tpu.memory_space<vmem>>, vector<1x128xf32>
    %136 = vector.broadcast %135 : vector<1x128xf32> to vector<16x128xf32>
    %137 = arith.addf %134, %136 : vector<16x128xf32>
    %c0_48 = arith.constant 0 : index
    %c0_49 = arith.constant 0 : index
    %c0_50 = arith.constant 0 : index
    %138 = vector.load %arg15[%c0_48, %c0_49, %c0_50] : memref<1x16x128xf32, #tpu.memory_space<vmem>>, vector<1x16x128xf32>
    %139 = vector.shape_cast %138 : vector<1x16x128xf32> to vector<16x128xf32>
    %140 = vector.shape_cast %137 : vector<16x128xf32> to vector<1x16x128xf32>
    tpu.vector_store %arg15[%c0_48, %c0_49, %c0_50], %140 {strides = array<i32>} : memref<1x16x128xf32, #tpu.memory_space<vmem>>, vector<1x16x128xf32>,
    return
  }
  func.func @transform_0(%arg0: i32) -> (i32, i32, i32) {
    %c0_i32 = arith.constant 0 : i32
    %c0_i32_0 = arith.constant 0 : i32
    %c0_i32_1 = arith.constant 0 : i32
    return %arg0, %c0_i32, %c0_i32_0 : i32, i32, i32
  }
  func.func @transform_1(%arg0: i32) -> (i32, i32, i32) {
    %c0_i32 = arith.constant 0 : i32
    %c0_i32_0 = arith.constant 0 : i32
    %c0_i32_1 = arith.constant 0 : i32
    return %arg0, %c0_i32, %c0_i32_0 : i32, i32, i32
  }
  func.func @transform_2(%arg0: i32) -> (i32, i32) {
    %c0_i32 = arith.constant 0 : i32
    %c0_i32_0 = arith.constant 0 : i32
    %c0_i32_1 = arith.constant 0 : i32
    return %c0_i32, %c0_i32_0 : i32, i32
  }
  func.func @transform_3(%arg0: i32) -> (i32, i32) {
    %c0_i32 = arith.constant 0 : i32
    %c0_i32_0 = arith.constant 0 : i32
    %c0_i32_1 = arith.constant 0 : i32
    return %c0_i32, %c0_i32_0 : i32, i32
  }
  func.func @transform_4(%arg0: i32) -> (i32, i32) {
    %c0_i32 = arith.constant 0 : i32
    %c0_i32_0 = arith.constant 0 : i32
    %c0_i32_1 = arith.constant 0 : i32
    return %c0_i32, %c0_i32_0 : i32, i32
  }
  func.func @transform_5(%arg0: i32) -> (i32, i32) {
    %c0_i32 = arith.constant 0 : i32
    %c0_i32_0 = arith.constant 0 : i32
    %c0_i32_1 = arith.constant 0 : i32
    return %c0_i32, %c0_i32_0 : i32, i32
  }
  func.func @transform_6(%arg0: i32) -> (i32, i32) {
    %c0_i32 = arith.constant 0 : i32
    %c0_i32_0 = arith.constant 0 : i32
    %c0_i32_1 = arith.constant 0 : i32
    return %c0_i32, %c0_i32_0 : i32, i32
  }
  func.func @transform_7(%arg0: i32) -> (i32, i32) {
    %c0_i32 = arith.constant 0 : i32
    %c0_i32_0 = arith.constant 0 : i32
    %c0_i32_1 = arith.constant 0 : i32
    return %c0_i32, %c0_i32_0 : i32, i32
  }
  func.func @transform_8(%arg0: i32) -> (i32, i32) {
    %c0_i32 = arith.constant 0 : i32
    %c0_i32_0 = arith.constant 0 : i32
    %c0_i32_1 = arith.constant 0 : i32
    return %c0_i32, %c0_i32_0 : i32, i32
  }
  func.func @transform_9(%arg0: i32) -> (i32, i32) {
    %c0_i32 = arith.constant 0 : i32
    %c0_i32_0 = arith.constant 0 : i32
    %c0_i32_1 = arith.constant 0 : i32
    return %c0_i32, %c0_i32_0 : i32, i32
  }
  func.func @transform_10(%arg0: i32) -> (i32, i32) {
    %c0_i32 = arith.constant 0 : i32
    %c0_i32_0 = arith.constant 0 : i32
    %c0_i32_1 = arith.constant 0 : i32
    return %c0_i32, %c0_i32_0 : i32, i32
  }
  func.func @transform_11(%arg0: i32) -> (i32, i32) {
    %c0_i32 = arith.constant 0 : i32
    %c0_i32_0 = arith.constant 0 : i32
    %c0_i32_1 = arith.constant 0 : i32
    return %c0_i32, %c0_i32_0 : i32, i32
  }
  func.func @transform_12(%arg0: i32) -> (i32, i32) {
    %c0_i32 = arith.constant 0 : i32
    %c0_i32_0 = arith.constant 0 : i32
    %c0_i32_1 = arith.constant 0 : i32
    return %c0_i32, %c0_i32_0 : i32, i32
  }
  func.func @transform_13(%arg0: i32) -> (i32, i32) {
    %c0_i32 = arith.constant 0 : i32
    %c0_i32_0 = arith.constant 0 : i32
    %c0_i32_1 = arith.constant 0 : i32
    return %c0_i32, %c0_i32_0 : i32, i32
  }
  func.func @transform_14(%arg0: i32) -> (i32, i32, i32) {
    %c0_i32 = arith.constant 0 : i32
    %c0_i32_0 = arith.constant 0 : i32
    %c0_i32_1 = arith.constant 0 : i32
    return %arg0, %c0_i32, %c0_i32_0 : i32, i32, i32
  }
}

</mosaic_0001>

<bundles_post_ra>
// kernel: tpu_custom_call.1
= control target key start
LH: loop header
LB: loop body
LE: loop exit
PB: predicated region body
PF: predicated region fallthrough
CT: control target
= control target key end

     0   :  { %s3272_s0 = inlined_call_operand.hbm [shape: f32[2,16,128], index: 0, kind: input, shape index: {}]   ;;  %s3273_s1 = inlined_call_operand.hbm [shape: f32[2,16,16], index: 1, kind: input, shape index: {}]   ;;  %s3274_s2 = inlined_call_operand.hbm [shape: bf16[128,384], index: 2, kind: input, shape index: {}]   ;;  %s3275_s3 = inlined_call_operand.hbm [shape: f32[1,384], index: 3, kind: input, shape index: {}]   ;;  %s3276_s4 = inlined_call_operand.hbm [shape: bf16[128,128], index: 4, kind: input, shape index: {}]   ;;  %s3277_s5 = inlined_call_operand.vmem [shape: f32[1,128], index: 5, kind: input, shape index: {}]   ;;  %s3278_s6 = inlined_call_operand.vmem [shape: f32[1,128], index: 6, kind: input, shape index: {}]   ;;  %s3279_s7 = inlined_call_operand.vmem [shape: f32[1,128], index: 7, kind: input, shape index: {}]   ;;  %s3280_s8 = inlined_call_operand.hbm [shape: bf16[128,256], index: 8, kind: input, shape index: {}]   ;;  %s3281_s9 = inlined_call_operand.vmem [shape: f32[1,256], index: 9, kind: input, shape index: {}]   ;;  %s3282_s10 = inlined_call_operand.hbm [shape: bf16[256,128], index: 10, kind: input, shape index: {}]   ;;  %s3283_s11 = inlined_call_operand.vmem [shape: f32[1,128], index: 11, kind: input, shape index: {}]   ;;  %s3284_s12 = inlined_call_operand.vmem [shape: f32[1,128], index: 12, kind: input, shape index: {}]   ;;  %s3285_s13 = inlined_call_operand.vmem [shape: f32[1,128], index: 13, kind: input, shape index: {}]   ;;  %s3286_s14 = inlined_call_operand.hbm [shape: f32[2,16,128], index: 14, kind: output, shape index: {}]  }
   0x1   :  { %3295 = sst [smem:[#allocation24_spill]] %s3272_s0 }
   0x2   :  { %3296 = sst [smem:[#allocation25_spill]] %s3274_s2 }
   0x3   :  { %3297 = sst [smem:[#allocation26_spill]] %s3275_s3 }
   0x4   :  { %3298 = sst [smem:[#allocation27_spill]] %s3276_s4 }
   0x5   :  { %3299 = sst [smem:[#allocation28_spill]] %s3280_s8 }
   0x6   :  { %3300 = sst [smem:[#allocation29_spill]] %s3282_s10 }
   0x7   :  { %3301 = sst [smem:[#allocation30_spill]] %s3284_s12 }
   0x8   :  { %3302 = sst [smem:[#allocation31_spill]] %s3285_s13 }
   0x9   :  { %3303 = sst [smem:[#allocation32_spill]] %s3286_s14 }
   0xa   :  { %19 = vsyncpa [#allocation3], 0 }
   0xb   :  { %21 = vsyncpa [#allocation3 + $0x1], 0 }
   0xc   :  { %22 = vsyncpa [#allocation6], 0 }
   0xd   :  { %24 = vsyncpa [#allocation6 + $0x1], 0 }
   0xe   :  { %25 = vsyncpa [#allocation9], 0 }
   0xf   :  { %26 = vsyncpa [#allocation12], 0 }
  0x10   :  { %27 = vsyncpa [#allocation4], 0 }
  0x11   :  { %29 = vsyncpa [#allocation4 + $0x1], 0  ;;  %s2911_s29 = smov 0   ;;  %s2913_s30 = smov 0  }
  0x12   :  { %s2915_s15 = smov 0   ;;  %s2917_s16 = smov 0  }
  0x13 LB: > { %3304 = sst [smem:[#allocation21_spill]] %s2813_s15  ;;  %s2935_s20 = sadd.s32 4294967295, %s2817_s16   ;;  %s2817_s16 = sphi %s2917_s16, %s3326_s16   ;;  %s2813_s15 = sphi %s2915_s15, %s3331_s15   ;;  %s2809_s30 = sphi %s2913_s30, %s3330_s30   ;;  %s2805_s29 = sphi %s2911_s29, %s3329_s29  }
  0x14   : > { %s3305_s2 = sld [smem:[#allocation25_spill]]  ;;  %p1945_p0 = scmp.ge.s32.totalorder %s2817_s16, 1 }
  0x15   : > { %p56_p1 = scmp.eq.s32.totalorder %s2935_s20, 0  ;;  %p370_p2 = scmp.lt.s32.totalorder %s2817_s16, 3 }
  0x16   : > { %s2819_s22 = smov [#allocation7]   ;;  %s3307_s3 = sld [smem:[#allocation26_spill]] }
  0x17   : > { %p2940_p3 = pnand %p1945_p0, %p370_p2  ;;  %s383_s23 = sshll.u32 %s2819_s22, 4  ;;  %s384_s23 = int_to_ptr.vmem [resolvable:$true] %s383_s23 }
  0x18   : > { %s3309_s8 = sld [smem:[#allocation28_spill]]  ;;  %s2820_s22 = smov [#allocation8]  }
  0x19   : > { %p2329_p4 = pneg %p2940_p3  ;;  %s2821_s14 = smov 192  }
  0x1a   : > { %s381_s19 = sshll.u32 %s3305_s2, 4  ;;  %s398_s2 = sshll.u32 %s2820_s22, 4  ;;  %s382_s19 = int_to_ptr.hbm [resolvable:$true] %s381_s19  ;;  %s399_s2 = int_to_ptr.vmem [resolvable:$true] %s398_s2 }
  0x1b   : > { %p2952_p6 = pnand %p2329_p4, %p56_p1  ;;  %s2822_s13 = smov 12  }
  0x1c   : > { %s396_s26 = sshll.u32 %s3307_s3, 4  ;;  %s2823_s24 = smov [#allocation11]   ;;  %s397_s26 = int_to_ptr.hbm [resolvable:$true] %s396_s26 }
  0x1d   : > { %2332 = dma.hbm_to_vmem [thread:$0]  (!%p2952_p6), %s382_s19, 3072, %s384_s23, [#allocation6], %s2821_s14, %s2821_s14, %s2822_s13  }
  0x1e   : > { %s430_s18 = sshll.u32 %s3309_s8, 4  ;;  %s432_s25 = sshll.u32 %s2823_s24, 4  ;;  %s431_s18 = int_to_ptr.hbm [resolvable:$true] %s430_s18  ;;  %s433_s25 = int_to_ptr.vmem [resolvable:$true] %s432_s25 }
  0x1f   : > { %2335 = dma.hbm_to_vmem [thread:$0]  (!%p2952_p6), %s397_s26, 48, %s399_s2, [#allocation9]  }
  0x20   : > { %s3310_s4 = sld [smem:[#allocation27_spill]]  ;;  %s3288_s17 = smov 128  }
  0x21   : > { %s3290_s22 = smov 8   ;;  %s2826_s2 = smov [#allocation10]  }
  0x22   : > { %2341 = dma.hbm_to_vmem [thread:$0]  (!%p2952_p6), %s431_s18, 2048, %s433_s25, [#allocation12], %s3288_s17, %s3288_s17, %s3290_s22  }
  0x23   : > { %s409_s13 = sshll.u32 %s2826_s2, 4  ;;  %s2827_s3 = smov 64   ;;  %s410_s13 = int_to_ptr.vmem [resolvable:$true] %s409_s13 }
  0x24   : > { %s2828_s12 = smov 4   ;;  %s3311_s10 = sld [smem:[#allocation29_spill]] }
  0x25   : > { %s2829_s26 = smov [#allocation13]   ;;  %s1944_s24 = sadd.s32 4294967294, %s2817_s16  }
  0x26   : > { %s407_s28 = sshll.u32 %s3310_s4, 4  ;;  %s449_s18 = sshll.u32 %s2829_s26, 4  ;;  %s408_s28 = int_to_ptr.hbm [resolvable:$true] %s407_s28  ;;  %s450_s18 = int_to_ptr.vmem [resolvable:$true] %s449_s18 }
  0x27   : > { %2338 = dma.hbm_to_vmem [thread:$0]  (!%p2952_p6), %s408_s28, 1024, %s410_s13, [#allocation9], %s2827_s3, %s2827_s3, %s2828_s12  }
  0x28   : > { %s2980_s25 = sadd.s32 1, %s2817_s16   ;;  %s42_s2 = sadd.s32 1, %s2813_s15 }
  0x29   : > { %3312 = sst [smem:[#allocation22_spill]] %s2980_s25  ;;  %s39_s28 = ssub.s32 %s2817_s16, %s2980_s25 }
  0x2a   : > { %s447_s23 = sshll.u32 %s3311_s10, 4  ;;  %p49_p7 = scmp.ne.s32.totalorder %s2813_s15, %s2809_s30  ;;  %s448_s23 = int_to_ptr.hbm [resolvable:$true] %s447_s23 }
  0x2b   : > { %2344 = dma.hbm_to_vmem [thread:$0]  (!%p2952_p6), %s448_s23, 2048, %s450_s18, [#allocation12], %s2827_s3, %s2827_s3, %s2828_s12  }
  0x2c   : > { %p40_p8 = scmp.eq.s32.totalorder %s39_s28, 0  ;;  %p50_p9 = scmp.eq.s32.totalorder %s2817_s16, 0 }
  0x2d   : > { %p55_p10 = scmp.ne.s32.totalorder %s2809_s30, %s2805_s29  ;;  %p357_p11 = scmp.eq.s32.totalorder %s2935_s20, 1 }
  0x2e   : > { %s2992_s13 = scalar_select %p40_p8, %s2813_s15, %s42_s2  }
  0x2f   : > { %p2994_p12 = por %p50_p9, %p49_p7  ;;  %p3000_p13 = por %p56_p1, %p55_p10 }
  0x30   : > { %3313 = sst [smem:[#allocation23_spill]] %s2992_s13  ;;  %p3004_p0 = por %p357_p11, %p49_p7 }
  0x31   : > { %p363_p2 = scmp.eq.s32.totalorder %s1944_s24, 1  ;;  %p2361_p4 = scmp.lt.s32.totalorder %s2817_s16, 2 }
  0x32   : > { %s472_s12 = sand.u32 1, %s2813_s15   ;;  %s2236_s26 = sshll.u32 %s2817_s16, 4 }
  0x33   : > { %p3010_p6 = por %p363_p2, %p55_p10  ;;  %s1952_s23 = sshll.u32 %s472_s12, 4 }
  0x34   : > { %s3318_s0 = sld [smem:[#allocation24_spill]]  ;;  %s476_s22 = scalar_lea.vmem [#allocation2], %s1952_s23 }
  0x35   : > { %s484_s4 = sshll.u32 %s476_s22, 4  ;;  %p3020_p7 = pnand %p2361_p4, %p2994_p12  ;;  %s485_s4 = int_to_ptr.vmem [resolvable:$true] %s484_s4 }
  0x36   : > { %s503_s13 = scalar_lea.hbm %s3273_s1, %s2236_s26  ;;  %s498_s15 = scalar_lea.vmem [#allocation5], %s1952_s23 }
  0x37   : > { %s3027_s25 = sshll.u32 %s498_s15, 4  ;;  %s504_s18 = sshll.u32 %s503_s13, 4  ;;  %s505_s18 = int_to_ptr.hbm [resolvable:$true] %s504_s18  ;;  %s507_s25 = int_to_ptr.vmem [resolvable:$true] %s3027_s25 }
  0x38   : > { %s473_s2 = scalar_lea.sflag [#allocation3], %s472_s12  ;;  %p2679_p9 = pneg %p3020_p7 }
  0x3a   : > { %s481_s28 = scalar_lea.hbm %s3318_s0, %s2236_s26  ;;  %s2682_s10 = scalar_lea.hbm %s3318_s0, 32 }
  0x3b   : > { %s482_s17 = sshll.u32 %s481_s28, 4  ;;  %s483_s17 = int_to_ptr.hbm [resolvable:$true] %s482_s17 }
  0x3c   : > { %s2675_s28 = sshra.s32 %s483_s17, 4  ;;  %s2676_s28 = int_to_ptr.hbm [resolvable:$true] %s2675_s28 }
  0x3d   : > { %s2677_s22 = scalar_lea.hbm %s2676_s28, 16  ;;  %p2683_p12 = scmp.lt.s32.totalorder %s2676_s28, %s3318_s0 }
  0x3e   : > { %p2678_p8 = scmp.ne.s32.totalorder %s2676_s28, %s2677_s22  ;;  %p2684_p2 = scmp.lt.s32.totalorder %s2682_s10, %s2677_s22 }
  0x40   : > { %p2680_p10 = pnand %p2679_p9, %p2678_p8  ;;  %p2685_p4 = por %p2684_p2, %p2683_p12 }
  0x42   : > { %p2681_p11 = pneg %p2680_p10 }
  0x44   : > { %p2686_p5 = pnand %p2685_p4, %p2681_p11 }
  0x46   : > { %2689 = shalt.err (!%p2686_p5)
}
  0x47   : > { %s3320_s15 = smov 8   ;;  %s3321_s13 = smov 128  }
  0x48   : > { %2348 = dma.hbm_to_vmem [thread:$0]  (!%p3020_p7), %s483_s17, 256, %s485_s4, %s473_s2, %s3321_s13, %s3321_s13, %s3320_s15  }
  0x49   : > { %s494_s12 = sand.u32 1, %s2817_s16   ;;  %s2705_s8 = sshra.s32 %s505_s18, 4  ;;  %s2706_s8 = int_to_ptr.hbm [resolvable:$true] %s2705_s8 }
  0x4a   : > { %s495_s14 = scalar_lea.sflag [#allocation6], %s494_s12  ;;  %s2707_s28 = scalar_lea.hbm %s2706_s8, 16 }
  0x4b   : > { %p2708_p8 = scmp.ne.s32.totalorder %s2706_s8, %s2707_s28  ;;  %s2712_s26 = scalar_lea.hbm %s3273_s1, 32 }
  0x4c   : > { %p2713_p11 = scmp.lt.s32.totalorder %s2706_s8, %s3273_s1  ;;  %p2714_p12 = scmp.lt.s32.totalorder %s2712_s26, %s2707_s28 }
  0x4d   : > { %p2710_p5 = pnand %p2708_p8, %p2679_p9 }
  0x4e   : > { %p2715_p2 = por %p2714_p12, %p2713_p11 }
  0x4f   : > { %p2711_p10 = pneg %p2710_p5 }
  0x51   : > { %p2716_p4 = pnand %p2715_p2, %p2711_p10 }
  0x53   : > { %2719 = shalt.err (!%p2716_p4)
}
  0x54   : > { %2351 = dma.hbm_to_vmem [thread:$0]  (!%p3020_p7), %s505_s18, 256, %s507_s25, %s495_s14, %s3321_s13, %s3321_s13, %s3320_s15  }
  0x55   : > { %518 = sbr.rel (%p2940_p3) target bundleno = 2066 (0x812), region = 76  ;;  %s3064_s4 = sand.u32 (!%p2940_p3), 1, %s2809_s30  }
  0x56   : > { %s3067_s0 = sshll.u32 (!%p2940_p3), %s3064_s4, 4  ;;  %s521_s17 = scalar_lea.sflag (!%p2940_p3), [#allocation3], %s3064_s4 }
  0x57   : > { %s524_s2 = scalar_lea.vmem (!%p2940_p3), [#allocation2], %s3067_s0 }
  0x5a   : > { %2780 = dma.done.wait (%p3000_p13), %s521_s17, 256  }
  0x5b   : > { %2782 = vsyncadd (%p3000_p13), %s521_s17, 4294967040  ;;  %s530_s21 = sand.u32 1, %s2935_s20   ;;  %s534_s24 = scalar_lea.vmem [#allocation5], %s3067_s0 }
  0x5c   : > { %s531_s25 = scalar_lea.sflag [#allocation6], %s530_s21 }
  0x5d   : > { %2784 = dma.done.wait (%p3000_p13), %s531_s25, 256  }
  0x5e   : > { %2786 = vsyncadd (%p3000_p13), %s531_s25, 4294967040 }
  0x5f   : > { %2788 = dma.done.wait (%p56_p1), [#allocation6], 3072  }
  0x60   : > { %2790 = vsyncadd (%p56_p1), [#allocation6], 4294964224 }
  0x61   : > { %2792 = dma.done.wait (%p56_p1), [#allocation9], 1072  }
  0x62   : > { %2794 = vsyncadd (%p56_p1), [#allocation9], 4294966224 }
  0x63   : > { %2796 = dma.done.wait (%p56_p1), [#allocation12], 4096  }
  0x64   : > { %2798 = vsyncadd (%p56_p1), [#allocation12], 4294963200  ;;  %v2053_v0 = vld [vmem:[#allocation7 + $0xa8] sm:$0xf]  ;;  %v2260_v1 = vld [vmem:[#allocation7 + $0xb0] sm:$0xf0] }
  0x65   : > { %v2259_v2 = vld [vmem:[#allocation7 + $0xac] sm:$0xf]  ;;  %v2054_v3 = vor.u32 %v2260_v1, %v2053_v0  ;;  %v2055_v4 = vld [vmem:[#allocation7 + $0xb4] sm:$0xf0]  ;;  %v2041_v5 = vld [vmem:[#allocation7 + $0x90] sm:$0xf] }
  0x66   : > { %v2257_v6 = vld [vmem:[#allocation7 + $0x98] sm:$0xf0]  ;;  %v2058_v7 = vor.u32 %v2259_v2, %v2055_v4  ;;  %v2256_v8 = vld [vmem:[#allocation7 + $0x94] sm:$0xf]  ;;  %v2043_v9 = vld [vmem:[#allocation7 + $0x9c] sm:$0xf0] }
  0x67   : > { %782 = vmatpush.bf16.msra.mxu0 %v2054_v3  ;;  %v2042_v10 = vor.u32 %v2257_v6, %v2041_v5  ;;  %v2046_v11 = vor.u32 %v2256_v8, %v2043_v9  ;;  %v2029_v12 = vld [vmem:[#allocation7 + $0x78] sm:$0xf]  ;;  %v2254_v13 = vld [vmem:[#allocation7 + $0x80] sm:$0xf0]  ;;  %v2253_v14 = vld [vmem:[#allocation7 + $0x7c] sm:$0xf] }
  0x68   : > { %796 = vmatpush.bf16.msra.mxu1 %v2058_v7  ;;  %v2031_v15 = vld [vmem:[#allocation7 + $0x84] sm:$0xf0]  ;;  %v2030_v16 = vor.u32 %v2254_v13, %v2029_v12  ;;  %v2017_v18 = vld [vmem:[#allocation7 + $0x60] sm:$0xf]  ;;  %v2251_v19 = vld [vmem:[#allocation7 + $0x68] sm:$0xf0] }
  0x69   : > { %v2034_v17 = vor.u32 %v2253_v14, %v2031_v15  ;;  %v2250_v20 = vld [vmem:[#allocation7 + $0x64] sm:$0xf]  ;;  %v2019_v21 = vld [vmem:[#allocation7 + $0x6c] sm:$0xf0]  ;;  %v2005_v22 = vld [vmem:[#allocation7 + $0x48] sm:$0xf]  ;;  %v2018_v23 = vor.u32 %v2251_v19, %v2017_v18 }
  0x6a   : > { %v2248_v24 = vld [vmem:[#allocation7 + $0x50] sm:$0xf0]  ;;  %v2247_v25 = vld [vmem:[#allocation7 + $0x4c] sm:$0xf]  ;;  %v2022_v26 = vor.u32 %v2250_v20, %v2019_v21  ;;  %v2007_v27 = vld [vmem:[#allocation7 + $0x54] sm:$0xf0] }
  0x6b   : > { %783 = vmatpush.bf16.msra.mxu0 %v2042_v10  ;;  %v2006_v28 = vor.u32 %v2248_v24, %v2005_v22  ;;  %v2010_v29 = vor.u32 %v2247_v25, %v2007_v27  ;;  %v1993_v30 = vld [vmem:[#allocation7 + $0x30] sm:$0xf]  ;;  %v2245_v31 = vld [vmem:[#allocation7 + $0x38] sm:$0xf0]  ;;  %v2244_v32 = vld [vmem:[#allocation7 + $0x34] sm:$0xf] }
  0x6c   : > { %797 = vmatpush.bf16.msra.mxu1 %v2046_v11  ;;  %v1995_v33 = vld [vmem:[#allocation7 + $0x3c] sm:$0xf0]  ;;  %v1994_v34 = vor.u32 %v2245_v31, %v1993_v30  ;;  %v1981_v36 = vld [vmem:[#allocation7 + $0x18] sm:$0xf]  ;;  %v2242_v37 = vld [vmem:[#allocation7 + $0x20] sm:$0xf0] }
  0x6d   : > { %v1998_v35 = vor.u32 %v2244_v32, %v1995_v33  ;;  %v2241_v38 = vld [vmem:[#allocation7 + $0x1c] sm:$0xf]  ;;  %v1983_v39 = vld [vmem:[#allocation7 + $0x24] sm:$0xf0]  ;;  %v1982_v40 = vor.u32 %v2242_v37, %v1981_v36  ;;  %v1969_v42 = vld [vmem:[#allocation7] sm:$0xf] }
  0x6e   : > { %v1986_v41 = vor.u32 %v2241_v38, %v1983_v39  ;;  %v2239_v43 = vld [vmem:[#allocation7 + $0x8] sm:$0xf0]  ;;  %v2238_v44 = vld [vmem:[#allocation7 + $0x4] sm:$0xf]  ;;  %v1971_v45 = vld [vmem:[#allocation7 + $0xc] sm:$0xf0] }
  0x6f   : > { %784 = vmatpush.bf16.msra.mxu0 %v2030_v16  ;;  %v1970_v46 = vor.u32 %v2239_v43, %v1969_v42  ;;  %v3095_v47 = vld [vmem:[%s524_s2] sm:$0xff]  ;;  %v3099_v48 = vld [vmem:[%s524_s2 + $0x8] sm:$0xff]  ;;  %v1974_v49 = vor.u32 %v2238_v44, %v1971_v45  ;;  %s2830_s27 = smov 32   ;;  %s2831_s18 = smov 64   ;;  %vm918_vm0 = vcmask 261120   ;;  %vm1047_vm1 = vcmask 130048  }
  0x70   : > { %798 = vmatpush.bf16.msra.mxu1 %v2034_v17  ;;  %v3103_v50 = vpack.c.bf16 %v3099_v48, %v3095_v47  ;;  %v3107_v51 = vld [vmem:[#allocation8] sm:$0x7]  ;;  %s2832_s15 = smov 96   ;;  %vm1282_vm2 = vcmask 523264   ;;  %vm1285_vm3 = vcmask 785408   ;;  %s3322_s25 = sld [smem:[#allocation30_spill]] }
  0x71   : > { %v649_v54 = vperm.slane %v3107_v51, 1  ;;  %v648_v56 = vperm.slane %v3107_v51, 0  ;;  %s3324_s14 = sld [smem:[#allocation32_spill]]  ;;  %s609_s28 = scalar_lea.vmem [#allocation14], %s3067_s0 }
  0x72   : > { %s1798_s22 = sshll.u32 %s609_s28, 4  ;;  %s1799_s22 = int_to_ptr.vmem [resolvable:$true] %s1798_s22 }
  0x73   : > { %785 = vmatpush.bf16.msra.mxu0 %v2018_v23 }
  0x74   : > { %799 = vmatpush.bf16.msra.mxu1 %v2022_v26 }
  0x77   : > { %786 = vmatpush.bf16.msra.mxu0 %v2006_v28  ;;  %s2755_s2 = scalar_lea.hbm %s3324_s14, 32 }
  0x78   : > { %800 = vmatpush.bf16.msra.mxu1 %v2010_v29 }
  0x7b   : > { %787 = vmatpush.bf16.msra.mxu0 %v1994_v34 }
  0x7c   : > { %801 = vmatpush.bf16.msra.mxu1 %v1998_v35 }
  0x7f   : > { %788 = vmatpush.bf16.msra.mxu0 %v1982_v40 }
  0x80   : > { %802 = vmatpush.bf16.msra.mxu1 %v1986_v41 }
  0x83   : > { %789 = vmatpush.bf16.msra.mxu0 %v1970_v46 }
  0x84   : > { %803 = vmatpush.bf16.msra.mxu1 %v1974_v49 }
  0x86   : > { %790 = vmatmul.bf16.vlgmr.msra.gmra.mxu0 %v3103_v50 }
  0x87   : > { %804 = vmatmul.bf16.vlgmr.msra.gmra.mxu1 %v3103_v50 }
 0x103   : > { %v791_v52 = vpop.f32.mrf.mxu0 }
 0x104   : > { %v805_v53 = vpop.f32.mrf.mxu1  ;;  %v792_v61 = vadd.f32 %v791_v52, %v648_v56 }
 0x105   : > { %v806_v55 = vadd.f32 %v805_v53, %v649_v54 }
 0x106   : > { %v844_v4 = vpack.c.bf16 %v792_v61, %v792_v61 }
 0x107   : > { %v872_v60 = vpack.c.bf16 %v806_v55, %v806_v55 }
 0x108   : > { %v910_v8 = vunpack.c.l.b16 %v844_v4 }
 0x109   : > { %v915_v1 = vunpack.c.l.b16 %v872_v60 }
 0x10b   : > { %v793_v57 = vpop.f32.mrf.mxu0 }
 0x10c   : > { %v807_v58 = vpop.f32.mrf.mxu1  ;;  %v794_v62 = vadd.f32 %v793_v57, %v648_v56 }
 0x10d   : > { %v808_v59 = vadd.f32 %v807_v58, %v649_v54 }
 0x10e   : > { %v845_v5 = vpack.c.bf16 %v794_v62, %v794_v62  ;;  %v2442_v7 = vpack.i.bf16 %v794_v62, %v792_v61 }
 0x10f   : > { %v2437_v63 = vpack.i.bf16 %v808_v59, %v806_v55  ;;  %v873_v0 = vpack.c.bf16 %v808_v59, %v808_v59 }
 0x110   : > { %v911_v9 = vunpack.c.l.b16 %v845_v5 }
 0x111   : > { %2438 = vrot.lane.b32.xlu2 %v2437_v63, %s2830_s27  ;;  %2428 = vrot.lane.b32.xlu1 %v2437_v63, %s2831_s18  ;;  %v916_v2 = vunpack.c.l.b16 %v873_v0 }
 0x112   : > { %2418 = vrot.lane.b32.xlu0 %v2437_v63, %s2832_s15  ;;  %v912_v10 = vpack.c.b16 %v911_v9, %v910_v8  ;;  %v3136_v8 = vld [vmem:[%s534_s24 + $0x8] sm:$0xff] }
 0x113   : > { %v917_v3 = vpack.c.b16 %v916_v2, %v915_v1  ;;  %v3126_v2 = vld [vmem:[%s534_s24] sm:$0xff] }
 0x115   : > { %v923_v6 = vsel %vm918_vm0, %v917_v3, 0 }
 0x116   : > { %932 = vmatpush.bf16.xpose.msra.mxu3 %v923_v6 }
 0x119   : > { %2443 = vrot.lane.b32.xlu2 %v2442_v7, %s2830_s27  ;;  %2433 = vrot.lane.b32.xlu1 %v2442_v7, %s2831_s18 }
 0x11a   : > { %2423 = vrot.lane.b32.xlu0 %v2442_v7, %s2832_s15 }
 0x11d   : > { %2063 = vmatmul.msk.bf16.vlgmr.msra.gmra.mxu3 %vm918_vm0, %v912_v10 }
 0x16b   : > { %v2439_v11 = vpop.permute.xlu2 %2438 }
 0x16c   : > { %v2441_v12 = vunpack.i.h.bf16 %v2439_v11  ;;  %v2440_v13 = vunpack.i.l.bf16 %v2439_v11 }
 0x16e   : > { %v879_v14 = vpack.c.bf16 %v2441_v12, %v2441_v12  ;;  %v878_v15 = vpack.c.bf16 %v2440_v13, %v2440_v13  ;;  %v2061_v12 = vld [vmem:[#allocation7 + $0xb0] sm:$0xf]  ;;  %v2261_v13 = vld [vmem:[#allocation7 + $0xb8] sm:$0xf0] }
 0x170   : > { %v1007_v16 = vunpack.c.l.b16 %v879_v14  ;;  %v1006_v17 = vunpack.c.l.b16 %v878_v15  ;;  %v2049_v14 = vld [vmem:[#allocation7 + $0x98] sm:$0xf]  ;;  %v2062_v15 = vor.u32 %v2261_v13, %v2061_v12 }
 0x172   : > { %v1008_v18 = vpack.c.b16 %v1007_v16, %v1006_v17  ;;  %v2258_v16 = vld [vmem:[#allocation7 + $0xa0] sm:$0xf0]  ;;  %810 = vmatpush.bf16.msra.mxu2 %v2062_v15 }
 0x173   : > { %v2444_v19 = vpop.permute.xlu2 %2443  ;;  %v2050_v17 = vor.u32 %v2258_v16, %v2049_v14  ;;  %v650_v14 = vperm.slane %v3107_v51, 2 }
 0x174   : > { %v2446_v20 = vunpack.i.h.bf16 %v2444_v19  ;;  %v2445_v21 = vunpack.i.l.bf16 %v2444_v19  ;;  %v1013_v22 = vsel %vm918_vm0, %v1008_v18, 0  ;;  %v2037_v18 = vld [vmem:[#allocation7 + $0x80] sm:$0xf]  ;;  %v2255_v19 = vld [vmem:[#allocation7 + $0x88] sm:$0xf0] }
 0x175   : > { %1022 = vmatpush.bf16.xpose.msrb.mxu0 %v1013_v22  ;;  %v2252_v22 = vld [vmem:[#allocation7 + $0x70] sm:$0xf0] }
 0x176   : > { %v851_v23 = vpack.c.bf16 %v2446_v20, %v2446_v20  ;;  %v850_v24 = vpack.c.bf16 %v2445_v21, %v2445_v21  ;;  %811 = vmatpush.bf16.msra.mxu2 %v2050_v17  ;;  %v2038_v20 = vor.u32 %v2255_v19, %v2037_v18  ;;  %v2025_v21 = vld [vmem:[#allocation7 + $0x68] sm:$0xf] }
 0x178   : > { %v1002_v25 = vunpack.c.l.b16 %v851_v23  ;;  %v1001_v26 = vunpack.c.l.b16 %v850_v24  ;;  %v2026_v23 = vor.u32 %v2252_v22, %v2025_v21  ;;  %v2013_v24 = vld [vmem:[#allocation7 + $0x50] sm:$0xf] }
 0x17a   : > { %v1003_v27 = vpack.c.b16 %v1002_v25, %v1001_v26  ;;  %812 = vmatpush.bf16.msra.mxu2 %v2038_v20  ;;  %v2249_v25 = vld [vmem:[#allocation7 + $0x58] sm:$0xf0] }
 0x17c   : > { %2066 = vmatmul.msk.bf16.vlgmr.msrb.gmra.mxu0 %vm918_vm0, %v1003_v27  ;;  %v2014_v27 = vor.u32 %v2249_v25, %v2013_v24 }
 0x17e   : > { %813 = vmatpush.bf16.msra.mxu2 %v2026_v23 }
 0x182   : > { %814 = vmatpush.bf16.msra.mxu2 %v2014_v27 }
 0x183   : > { %v2429_v28 = vpop.permute.xlu1 %2428 }
 0x184   : > { %v2431_v29 = vunpack.i.h.bf16 %v2429_v28  ;;  %v2430_v30 = vunpack.i.l.bf16 %v2429_v28  ;;  %v2419_v31 = vpop.permute.xlu0 %2418  ;;  %v2001_v28 = vld [vmem:[#allocation7 + $0x38] sm:$0xf] }
 0x185   : > { %v2421_v32 = vunpack.i.h.bf16 %v2419_v31  ;;  %v2420_v33 = vunpack.i.l.bf16 %v2419_v31  ;;  %v1989_v31 = vld [vmem:[#allocation7 + $0x20] sm:$0xf] }
 0x186   : > { %v877_v34 = vpack.c.bf16 %v2431_v29, %v2431_v29  ;;  %v876_v35 = vpack.c.bf16 %v2430_v30, %v2430_v30  ;;  %v2246_v29 = vld [vmem:[#allocation7 + $0x40] sm:$0xf0] }
 0x187   : > { %v875_v36 = vpack.c.bf16 %v2421_v32, %v2421_v32  ;;  %v874_v37 = vpack.c.bf16 %v2420_v33, %v2420_v33  ;;  %v2002_v30 = vor.u32 %v2246_v29, %v2001_v28  ;;  %v2243_v32 = vld [vmem:[#allocation7 + $0x28] sm:$0xf0] }
 0x188   : > { %v977_v38 = vunpack.c.l.b16 %v877_v34  ;;  %v976_v39 = vunpack.c.l.b16 %v876_v35  ;;  %v1990_v34 = vor.u32 %v2243_v32, %v1989_v31 }
 0x189   : > { %v947_v40 = vunpack.c.l.b16 %v875_v36  ;;  %v946_v41 = vunpack.c.l.b16 %v874_v37  ;;  %815 = vmatpush.bf16.msra.mxu2 %v2002_v30  ;;  %v1977_v37 = vld [vmem:[#allocation7 + $0x8] sm:$0xf] }
 0x18a   : > { %v978_v42 = vpack.c.b16 %v977_v38, %v976_v39  ;;  %v2240_v38 = vld [vmem:[#allocation7 + $0x10] sm:$0xf0] }
 0x18b   : > { %v948_v43 = vpack.c.b16 %v947_v40, %v946_v41  ;;  %v2434_v58 = vpop.permute.xlu1 %2433  ;;  %v1978_v39 = vor.u32 %v2240_v38, %v1977_v37 }
 0x18c   : > { %v2424_v44 = vpop.permute.xlu0 %2423  ;;  %v983_v45 = vsel %vm918_vm0, %v978_v42, 0  ;;  %v2436_v59 = vunpack.i.h.bf16 %v2434_v58  ;;  %v2435_v60 = vunpack.i.l.bf16 %v2434_v58 }
 0x18d   : > { %v2426_v46 = vunpack.i.h.bf16 %v2424_v44  ;;  %v2425_v49 = vunpack.i.l.bf16 %v2424_v44  ;;  %v953_v52 = vsel %vm918_vm0, %v948_v43, 0  ;;  %816 = vmatpush.bf16.msra.mxu2 %v1990_v34 }
 0x18e   : > { %962 = vmatpush.bf16.xpose.msrb.mxu3 %v953_v52  ;;  %v849_v61 = vpack.c.bf16 %v2436_v59, %v2436_v59  ;;  %v848_v62 = vpack.c.bf16 %v2435_v60, %v2435_v60 }
 0x18f   : > { %v847_v53 = vpack.c.bf16 %v2426_v46, %v2426_v46  ;;  %v846_v54 = vpack.c.bf16 %v2425_v49, %v2425_v49 }
 0x190   : > { %v972_v63 = vunpack.c.l.b16 %v849_v61  ;;  %v971_v0 = vunpack.c.l.b16 %v848_v62 }
 0x191   : > { %v942_v55 = vunpack.c.l.b16 %v847_v53  ;;  %v941_v56 = vunpack.c.l.b16 %v846_v54  ;;  %817 = vmatpush.bf16.msra.mxu2 %v1978_v39 }
 0x192   : > { %v973_v4 = vpack.c.b16 %v972_v63, %v971_v0 }
 0x193   : > { %v943_v57 = vpack.c.b16 %v942_v55, %v941_v56 }
 0x194   : > { %818 = vmatmul.bf16.vlgmr.msra.gmra.mxu2 %v3103_v50 }
 0x195   : > { %2064 = vmatmul.msk.bf16.vlgmr.msrb.gmra.mxu3 %vm918_vm0, %v943_v57 }
 0x196   : > { %992 = vmatpush.bf16.xpose.msra.mxu3 %v983_v45 }
 0x1a0   : > { %v934_v1 = vpop.f32.mrf.mxu3 }
 0x1a1   : > { %v1029_v3 = vmul.f32 0.17677669, %v934_v1 }
 0x1a3   : > { %v3129_v5 = vadd.f32 %v3126_v2, %v1029_v3 }
 0x1a5   : > { %2065 = vmatmul.msk.bf16.vlgmr.msra.gmra.mxu3 %vm918_vm0, %v973_v4  ;;  %v1048_v6 = vsel %vm1047_vm1, %v3129_v5, -inf }
 0x1a6   : > { %1049 = vmax.xlane.f32.xlu0 %v1048_v6 }
 0x1a8   : > { %v936_v7 = vpop.f32.mrf.mxu3 }
 0x1a9   : > { %v1030_v9 = vmul.f32 0.17677669, %v936_v7 }
 0x1ab   : > { %v1040_v10 = vadd.f32 %v3136_v8, %v1030_v9 }
 0x1ad   : > { %v1051_v11 = vsel %vm1047_vm1, %v1040_v10, -inf }
 0x1ae   : > { %1052 = vmax.xlane.f32.xlu1 %v1051_v11 }
 0x1f9   : > { %v1024_v26 = vpop.f32.mrf.mxu0 }
 0x1fa   : > { %v1035_v54 = vmul.f32 0.17677669, %v1024_v26 }
 0x1fc   : > { %v1045_v59 = vadd.f32 %v3126_v2, %v1035_v54 }
 0x1fe   : > { %v1066_v62 = vsel %vm1047_vm1, %v1045_v59, -inf }
 0x201   : > { %v1026_v33 = vpop.f32.mrf.mxu0 }
 0x202   : > { %v1036_v35 = vmul.f32 0.17677669, %v1026_v33 }
 0x204   : > { %v3141_v36 = vadd.f32 %v3136_v8, %v1036_v35 }
 0x206   : > { %v1069_v40 = vsel %vm1047_vm1, %v3141_v36, -inf }
 0x207   : > { %1070 = vmax.xlane.f32.xlu0 %v1069_v40 }
 0x218   : > { %v964_v41 = vpop.f32.mrf.mxu3 }
 0x219   : > { %v1031_v42 = vmul.f32 0.17677669, %v964_v41  ;;  %v1050_v50 = vpop.xlane.xlu0 %1049 }
 0x21a   : > { %v1072_v61 = vsub.f32 %v3129_v5, %v1050_v50 }
 0x21b   : > { %v1041_v43 = vadd.f32 %v3126_v2, %v1031_v42 }
 0x21c   : > { %v1080_v0 = vmul.f32 1.442695, %v1072_v61 }
 0x21d   : > { %v1054_v44 = vsel %vm1047_vm1, %v1041_v43, -inf }
 0x21e   : > { %1055 = vmax.xlane.f32.xlu2 %v1054_v44 }
 0x220   : > { %v966_v45 = vpop.f32.mrf.mxu3 }
 0x221   : > { %v1032_v46 = vmul.f32 0.17677669, %v966_v45  ;;  %v1053_v49 = vpop.xlane.xlu1 %1052 }
 0x222   : > { %v1073_v53 = vsub.f32 %v1040_v10, %v1053_v49  ;;  %v819_v10 = vpop.f32.mrf.mxu2 }
 0x223   : > { %v1042_v52 = vadd.f32 %v3136_v8, %v1032_v46  ;;  %v820_v15 = vadd.f32 %v819_v10, %v650_v14 }
 0x224   : > { %v1082_v56 = vmul.f32 1.442695, %v1073_v53 }
 0x225   : > { %v1057_v55 = vsel %vm1047_vm1, %v1042_v52, -inf  ;;  %v900_v19 = vpack.c.bf16 %v820_v15, %v820_v15 }
 0x226   : > { %1058 = vmax.xlane.f32.xlu2 %v1057_v55  ;;  %2483 = vpow2.f32 %v1082_v56 }
 0x227   : > { %2485 = vpow2.f32 %v1080_v0  ;;  %v1151_v22 = vunpack.c.l.b16 %v900_v19 }
 0x228   : > { %v994_v57 = vpop.f32.mrf.mxu3 }
 0x229   : > { %v1033_v58 = vmul.f32 0.17677669, %v994_v57 }
 0x22b   : > { %v1043_v60 = vadd.f32 %v3126_v2, %v1033_v58 }
 0x22c   : > { %v3155_v4 = vpop.eup %2483 }
 0x22d   : > { %v1060_v63 = vsel %vm1047_vm1, %v1043_v60, -inf  ;;  %v1099_v2 = vsel %vm1047_vm1, %v3155_v4, 0.0  ;;  %v2486_v7 = vpop.eup %2485 }
 0x22e   : > { %1067 = vmax.xlane.f32.xlu2 %v1066_v62  ;;  %1061 = vmax.xlane.f32.xlu0 %v1060_v63  ;;  %v1096_v9 = vsel %vm1047_vm1, %v2486_v7, 0.0 }
 0x230   : > { %v996_v1 = vpop.f32.mrf.mxu3 }
 0x231   : > { %v1034_v3 = vmul.f32 0.17677669, %v996_v1 }
 0x233   : > { %v1044_v6 = vadd.f32 %v3136_v8, %v1034_v3  ;;  %v821_v8 = vpop.f32.mrf.mxu2 }
 0x234   : > { %v822_v16 = vadd.f32 %v821_v8, %v650_v14 }
 0x235   : > { %v1063_v5 = vsel %vm1047_vm1, %v1044_v6, -inf }
 0x236   : > { %1100 = vadd.xlane.f32.xlu2 %v1099_v2  ;;  %1064 = vmax.xlane.f32.xlu1 %v1063_v5  ;;  %v901_v20 = vpack.c.bf16 %v822_v16, %v822_v16  ;;  %v2447_v61 = vpack.i.bf16 %v822_v16, %v820_v15 }
 0x238   : > { %v1152_v23 = vunpack.c.l.b16 %v901_v20 }
 0x23a   : > { %v1153_v27 = vpack.c.b16 %v1152_v23, %v1151_v22 }
 0x23c   : > { %1165 = vmatpush.bf16.msrb.mxu2 %v1153_v27 }
 0x23e   : > { %1097 = vadd.xlane.f32.xlu1 %v1096_v9 }
 0x27a   : > { %v1071_v17 = vpop.xlane.xlu0 %1070 }
 0x27b   : > { %v1079_v31 = vsub.f32 %v3141_v36, %v1071_v17 }
 0x27d   : > { %v1094_v37 = vmul.f32 1.442695, %v1079_v31 }
 0x291   : > { %v1056_v11 = vpop.xlane.xlu2 %1055 }
 0x292   : > { %v1074_v12 = vsub.f32 %v1041_v43, %v1056_v11 }
 0x294   : > { %v1084_v13 = vmul.f32 1.442695, %v1074_v12 }
 0x296   : > { %2487 = vpow2.f32 %v1084_v13 }
 0x299   : > { %v1059_v18 = vpop.xlane.xlu2 %1058 }
 0x29a   : > { %v1075_v21 = vsub.f32 %v1042_v52, %v1059_v18 }
 0x29c   : > { %v3163_v24 = vpop.eup %2487  ;;  %v1086_v25 = vmul.f32 1.442695, %v1075_v21 }
 0x29d   : > { %v1102_v26 = vsel %vm1047_vm1, %v3163_v24, 0.0 }
 0x29e   : > { %2489 = vpow2.f32 %v1086_v25  ;;  %1103 = vadd.xlane.f32.xlu0 %v1102_v26 }
 0x2a1   : > { %v1068_v51 = vpop.xlane.xlu2 %1067  ;;  %v1062_v28 = vpop.xlane.xlu0 %1061 }
 0x2a2   : > { %v1078_v29 = vsub.f32 %v1045_v59, %v1068_v51  ;;  %v1076_v30 = vsub.f32 %v1043_v60, %v1062_v28 }
 0x2a4   : > { %v2490_v32 = vpop.eup %2489  ;;  %v1092_v33 = vmul.f32 1.442695, %v1078_v29  ;;  %v1088_v34 = vmul.f32 1.442695, %v1076_v30 }
 0x2a5   : > { %v1105_v35 = vsel %vm1047_vm1, %v2490_v32, 0.0 }
 0x2a6   : > { %2491 = vpow2.f32 %v1092_v33  ;;  %1106 = vadd.xlane.f32.xlu1 %v1105_v35 }
 0x2a7   : > { %2493 = vpow2.f32 %v1088_v34 }
 0x2a8   : > { %2495 = vpow2.f32 %v1094_v37 }
 0x2a9   : > { %v1101_v38 = vpop.xlane.xlu2 %1100  ;;  %v1065_v39 = vpop.xlane.xlu1 %1064 }
 0x2aa   : > { %2497 = vrcp.f32 %v1101_v38  ;;  %v1077_v41 = vsub.f32 %v1044_v6, %v1065_v39 }
 0x2ac   : > { %v3169_v40 = vpop.eup %2491  ;;  %v1090_v44 = vmul.f32 1.442695, %v1077_v41 }
 0x2ad   : > { %v2494_v42 = vpop.eup %2493  ;;  %v1114_v36 = vsel %vm1047_vm1, %v3169_v40, 0.0 }
 0x2ae   : > { %1115 = vadd.xlane.f32.xlu0 %v1114_v36  ;;  %v1108_v43 = vsel %vm1047_vm1, %v2494_v42, 0.0  ;;  %v3174_v45 = vpop.eup %2495 }
 0x2af   : > { %1109 = vadd.xlane.f32.xlu2 %v1108_v43  ;;  %v1117_v53 = vsel %vm1047_vm1, %v3174_v45, 0.0 }
 0x2b0   : > { %v2498_v49 = vpop.eup %2497 }
 0x2b1   : > { %v1098_v46 = vpop.xlane.xlu1 %1097  ;;  %v1129_v52 = vmul.f32 %v2498_v49, %v3155_v4 }
 0x2b2   : > { %2499 = vrcp.f32 %v1098_v46 }
 0x2b3   : > { %2501 = vpow2.f32 %v1090_v44  ;;  %v1137_v55 = vpack.c.bf16 %v1129_v52, %v1129_v52 }
 0x2b5   : > { %v1147_v58 = vunpack.c.l.b16 %v1137_v55 }
 0x2b6   : > { %1118 = vadd.xlane.f32.xlu0 %v1117_v53 }
 0x2b8   : > { %v2500_v54 = vpop.eup %2499 }
 0x2b9   : > { %v1128_v56 = vmul.f32 %v2500_v54, %v2486_v7  ;;  %v2502_v57 = vpop.eup %2501 }
 0x2ba   : > { %v1111_v60 = vsel %vm1047_vm1, %v2502_v57, 0.0 }
 0x2bb   : > { %v1136_v50 = vpack.c.bf16 %v1128_v56, %v1128_v56 }
 0x2bd   : > { %v1146_v59 = vunpack.c.l.b16 %v1136_v50 }
 0x2be   : > { %1112 = vadd.xlane.f32.xlu0 %v1111_v60 }
 0x2bf   : > { %2448 = vrot.lane.b32.xlu1 %v2447_v61, %s2832_s15  ;;  %v1148_v62 = vpack.c.b16 %v1147_v58, %v1146_v59 }
 0x2c1   : > { %2067 = vmatmul.msk.bf16.vlgmr.msrb.gmra.mxu2 %vm1047_vm1, %v1148_v62 }
 0x2c7   : > { %2453 = vrot.lane.b32.xlu2 %v2447_v61, %s2831_s18 }
 0x2d2   : > { %2458 = vrot.lane.b32.xlu0 %v2447_v61, %s2830_s27 }
 0x311   : > { %v1104_v63 = vpop.xlane.xlu0 %1103 }
 0x319   : > { %v1107_v3 = vpop.xlane.xlu1 %1106 }
 0x31a   : > { %2503 = vrcp.f32 %v1107_v3 }
 0x31b   : > { %2505 = vrcp.f32 %v1104_v63 }
 0x320   : > { %v2504_v7 = vpop.eup %2503 }
 0x321   : > { %v1116_v0 = vpop.xlane.xlu0 %1115  ;;  %v2506_v11 = vpop.eup %2505  ;;  %v1131_v12 = vmul.f32 %v2504_v7, %v2490_v32  ;;  %v2267_v7 = vld [vmem:[#allocation10 + $0x28] sm:$0xff] }
 0x322   : > { %v1110_v1 = vpop.xlane.xlu2 %1109  ;;  %v1130_v8 = vmul.f32 %v2506_v11, %v3163_v24  ;;  %v2264_v11 = vld [vmem:[#allocation10 + $0x10] sm:$0xff] }
 0x323   : > { %2507 = vrcp.f32 %v1110_v1  ;;  %v1139_v21 = vpack.c.bf16 %v1131_v12, %v1131_v12  ;;  %v2263_v12 = vld [vmem:[#allocation10 + $0x8] sm:$0xff] }
 0x324   : > { %v1138_v25 = vpack.c.bf16 %v1130_v8, %v1130_v8 }
 0x325   : > { %v1175_v28 = vunpack.c.l.b16 %v1139_v21 }
 0x326   : > { %v1174_v31 = vunpack.c.l.b16 %v1138_v25 }
 0x328   : > { %v1176_v33 = vpack.c.b16 %v1175_v28, %v1174_v31 }
 0x329   : > { %v1119_v4 = vpop.xlane.xlu0 %1118  ;;  %v2508_v18 = vpop.eup %2507 }
 0x32a   : > { %v2454_v6 = vpop.permute.xlu2 %2453  ;;  %v1132_v26 = vmul.f32 %v2508_v18, %v2494_v42 }
 0x32b   : > { %v2456_v2 = vunpack.i.h.bf16 %v2454_v6  ;;  %v2455_v5 = vunpack.i.l.bf16 %v2454_v6 }
 0x32c   : > { %v1140_v24 = vpack.c.bf16 %v1132_v26, %v1132_v26 }
 0x32d   : > { %v905_v9 = vpack.c.bf16 %v2456_v2, %v2456_v2  ;;  %v904_v10 = vpack.c.bf16 %v2455_v5, %v2455_v5  ;;  %v2269_v2 = vld [vmem:[#allocation10 + $0x38] sm:$0xff]  ;;  %v2268_v5 = vld [vmem:[#allocation10 + $0x30] sm:$0xff] }
 0x32e   : > { %v1202_v35 = vunpack.c.l.b16 %v1140_v24  ;;  %1357 = vmatpush.bf16.msrb.mxu1 %v2269_v2  ;;  %v2137_v2 = vld [vmem:[#allocation11 + $0x40] sm:$0xf] }
 0x32f   : > { %v1208_v13 = vunpack.c.l.b16 %v905_v9  ;;  %v1207_v14 = vunpack.c.l.b16 %v904_v10  ;;  %v2266_v9 = vld [vmem:[#allocation10 + $0x20] sm:$0xff]  ;;  %v2265_v10 = vld [vmem:[#allocation10 + $0x18] sm:$0xff] }
 0x331   : > { %v1209_v15 = vpack.c.b16 %v1208_v13, %v1207_v14  ;;  %v1113_v16 = vpop.xlane.xlu0 %1112  ;;  %v2449_v17 = vpop.permute.xlu1 %2448  ;;  %v2262_v13 = vld [vmem:[#allocation10] sm:$0xff] }
 0x332   : > { %2509 = vrcp.f32 %v1113_v16  ;;  %v2451_v19 = vunpack.i.h.bf16 %v2449_v17  ;;  %v2450_v20 = vunpack.i.l.bf16 %v2449_v17  ;;  %1358 = vmatpush.bf16.msrb.mxu1 %v2268_v5  ;;  %v2279_v5 = vld [vmem:[#allocation11 + $0x44] sm:$0xf0] }
 0x333   : > { %1221 = vmatpush.bf16.msrb.mxu3 %v1209_v15  ;;  %2511 = vrcp.f32 %v1119_v4 }
 0x334   : > { %v903_v22 = vpack.c.bf16 %v2451_v19, %v2451_v19  ;;  %v902_v23 = vpack.c.bf16 %v2450_v20, %v2450_v20  ;;  %2513 = vrcp.f32 %v1116_v0 }
 0x336   : > { %v1180_v27 = vunpack.c.l.b16 %v903_v22  ;;  %v1179_v51 = vunpack.c.l.b16 %v902_v23  ;;  %1359 = vmatpush.bf16.msrb.mxu1 %v2267_v7  ;;  %v2278_v7 = vld [vmem:[#allocation11 + $0x44] sm:$0xf] }
 0x338   : > { %v2510_v29 = vpop.eup %2509  ;;  %v1181_v30 = vpack.c.b16 %v1180_v27, %v1179_v51 }
 0x339   : > { %v1133_v32 = vmul.f32 %v2510_v29, %v2502_v57  ;;  %v2512_v38 = vpop.eup %2511  ;;  %v2477_v29 = vld [vmem:[%s3277_s5] ss:$0 sm:$0xff] }
 0x33a   : > { %1193 = vmatpush.bf16.msra.mxu2 %v1181_v30  ;;  %v2514_v41 = vpop.eup %2513  ;;  %v1135_v42 = vmul.f32 %v2512_v38, %v3174_v45  ;;  %1360 = vmatpush.bf16.msrb.mxu1 %v2266_v9  ;;  %v2138_v9 = vor.u32 %v2279_v5, %v2137_v2  ;;  %v2479_v5 = vld [vmem:[%s3279_s7] ss:$0 sm:$0xff] }
 0x33b   : > { %v1141_v34 = vpack.c.bf16 %v1133_v32, %v1133_v32  ;;  %v1134_v36 = vmul.f32 %v2514_v41, %v3169_v40 }
 0x33c   : > { %v1143_v49 = vpack.c.bf16 %v1135_v42, %v1135_v42 }
 0x33d   : > { %v1203_v37 = vunpack.c.l.b16 %v1141_v34  ;;  %2068 = vmatmul.msk.bf16.vlgmr.msra.gmra.mxu2 %vm1047_vm1, %v1176_v33  ;;  %v1142_v54 = vpack.c.bf16 %v1134_v36, %v1134_v36 }
 0x33e   : > { %v1231_v57 = vunpack.c.l.b16 %v1143_v49  ;;  %1361 = vmatpush.bf16.msrb.mxu1 %v2265_v10  ;;  %v2139_v10 = vld [vmem:[#allocation11 + $0x48] sm:$0xf0] }
 0x33f   : > { %v1204_v39 = vpack.c.b16 %v1203_v37, %v1202_v35  ;;  %v1230_v58 = vunpack.c.l.b16 %v1142_v54  ;;  %v2833_v35 = vmov 128.0   ;;  %v2161_v54 = vld [vmem:[#allocation11 + $0x70] sm:$0xf] }
 0x340   : > { %2515 = vrcp.f32 %v2833_v35 }
 0x341   : > { %2069 = vmatmul.msk.bf16.vlgmr.msrb.gmra.mxu3 %vm1047_vm1, %v1204_v39  ;;  %v1232_v59 = vpack.c.b16 %v1231_v57, %v1230_v58 }
 0x342   : > { %1362 = vmatpush.bf16.msrb.mxu1 %v2264_v11  ;;  %v2142_v11 = vor.u32 %v2278_v7, %v2139_v10 }
 0x344   : > { %v2459_v43 = vpop.permute.xlu0 %2458  ;;  %v1167_v60 = vpop.f32.mrf.mxu2 }
 0x345   : > { %v2461_v44 = vunpack.i.h.bf16 %v2459_v43  ;;  %v2460_v46 = vunpack.i.l.bf16 %v2459_v43 }
 0x346   : > { %1363 = vmatpush.bf16.msrb.mxu1 %v2263_v12  ;;  %v2516_v37 = vpop.eup %2515  ;;  %v2129_v12 = vld [vmem:[#allocation11 + $0x30] sm:$0xf] }
 0x347   : > { %v907_v52 = vpack.c.bf16 %v2461_v44, %v2461_v44  ;;  %v906_v53 = vpack.c.bf16 %v2460_v46, %v2460_v46  ;;  %v1378_v38 = vmul.f32 128.0, %v2516_v37  ;;  %vm1382_vm4 = vweird.f32 %v2516_v37 }
 0x349   : > { %v1236_v55 = vunpack.c.l.b16 %v907_v52  ;;  %v1235_v56 = vunpack.c.l.b16 %v906_v53  ;;  %v1379_v39 = vsub.f32 1.0, %v1378_v38  ;;  %v2293_v38 = vld [vmem:[#allocation13 + $0x38] sm:$0xff] }
 0x34a   : > { %1364 = vmatpush.bf16.msrb.mxu1 %v2262_v13  ;;  %v2277_v13 = vld [vmem:[#allocation11 + $0x34] sm:$0xf0] }
 0x34b   : > { %v1237_v50 = vpack.c.b16 %v1236_v55, %v1235_v56  ;;  %v1380_v41 = vmul.f32 %v2516_v37, %v1379_v39  ;;  %v2285_v55 = vld [vmem:[#allocation11 + $0x74] sm:$0xf0]  ;;  %v2284_v56 = vld [vmem:[#allocation11 + $0x74] sm:$0xf] }
 0x34c   : > { %v1169_v45 = vpop.f32.mrf.mxu2  ;;  %v2162_v57 = vor.u32 %v2285_v55, %v2161_v54  ;;  %v2301_v39 = vld [vmem:[#allocation13 + $0x78] sm:$0xff]  ;;  %v2299_v54 = vld [vmem:[#allocation13 + $0x68] sm:$0xff] }
 0x34d   : > { %1249 = vmatpush.bf16.msra.mxu0 %v1237_v50  ;;  %v1381_v42 = vadd.f32 %v2516_v37, %v1380_v41  ;;  %v2163_v50 = vld [vmem:[#allocation11 + $0x78] sm:$0xf0] }
 0x34e   : > { %v2166_v58 = vor.u32 %v2284_v56, %v2163_v50  ;;  %1535 = vmatpush.bf16.msrb.mxu2 %v2162_v57  ;;  %1715 = vmatpush.bf16.msra.mxu1 %v2301_v39  ;;  %v2290_v57 = vld [vmem:[#allocation13 + $0x20] sm:$0xff] }
 0x34f   : > { %v3200_v36 = vsel %vm1382_vm4, %v2516_v37, %v1381_v42  ;;  %v2298_v50 = vld [vmem:[#allocation13 + $0x60] sm:$0xff] }
 0x350   : > { %2070 = vmatmul.msk.bf16.vlgmr.msra.gmra.mxu0 %vm1047_vm1, %v1232_v59  ;;  %1549 = vmatpush.bf16.msra.mxu3 %v2166_v58  ;;  %v2153_v59 = vld [vmem:[#allocation11 + $0x60] sm:$0xf] }
 0x351   : > { %1701 = vmatpush.bf16.msrb.mxu0 %v2293_v38 }
 0x3c0   : > { %v1195_v61 = vpop.f32.mrf.mxu2 }
 0x3c4   : > { %v1223_v40 = vpop.f32.mrf.mxu3 }
 0x3c8   : > { %v1197_v62 = vpop.f32.mrf.mxu2 }
 0x3c9   : > { %v2462_v63 = vpack.i.bf16 %v1197_v62, %v1195_v61 }
 0x3cb   : > { %2463 = vrot.lane.b32.xlu1 %v2462_v63, %s2830_s27  ;;  %v2145_v63 = vld [vmem:[#allocation11 + $0x50] sm:$0xf] }
 0x3cc   : > { %v1225_v0 = vpop.f32.mrf.mxu3 }
 0x3cd   : > { %v2467_v1 = vpack.i.bf16 %v1225_v0, %v1223_v40  ;;  %v1251_v3 = vpop.f32.mrf.mxu0  ;;  %v2155_v40 = vld [vmem:[#allocation11 + $0x68] sm:$0xf0]  ;;  %v2281_v0 = vld [vmem:[#allocation11 + $0x54] sm:$0xf0] }
 0x3cf   : > { %2468 = vrot.lane.b32.xlu2 %v2467_v1, %s2831_s18  ;;  %v2280_v1 = vld [vmem:[#allocation11 + $0x54] sm:$0xf]  ;;  %s3323_s18 = sld [smem:[#allocation31_spill]] }
 0x3d5   : > { %v1253_v4 = vpop.f32.mrf.mxu0 }
 0x3d6   : > { %v2472_v6 = vpack.i.bf16 %v1253_v4, %v1251_v3  ;;  %v2146_v3 = vor.u32 %v2281_v0, %v2145_v63  ;;  %v2147_v4 = vld [vmem:[#allocation11 + $0x58] sm:$0xf0] }
 0x3d8   : > { %2473 = vrot.lane.b32.xlu1 %v2472_v6, %s2832_s15  ;;  %v2150_v6 = vor.u32 %v2280_v1, %v2147_v4  ;;  %v2478_v1 = vld [vmem:[%s3278_s6] ss:$0 sm:$0xff]  ;;  %s2302_s15 = sshll.u32 %s2935_s20, 4  ;;  %s1786_s20 = scalar_lea.sflag [#allocation4], %s3064_s4 }
 0x3d9   : > { %s1797_s8 = scalar_lea.hbm %s3324_s14, %s2302_s15 }
 0x3da   : > { %s1800_s10 = sshll.u32 %s1797_s8, 4  ;;  %s1801_s10 = int_to_ptr.hbm [resolvable:$true] %s1800_s10 }
 0x3db   : > { %s2749_s26 = sshra.s32 %s1801_s10, 4  ;;  %s2750_s26 = int_to_ptr.hbm [resolvable:$true] %s2749_s26 }
 0x3dc   : > { %s2751_s23 = scalar_lea.hbm %s2750_s26, 16  ;;  %p2756_p7 = scmp.lt.s32.totalorder %s2750_s26, %s3324_s14 }
 0x3dd   : > { %p2752_p1 = scmp.ne.s32.totalorder %s2750_s26, %s2751_s23  ;;  %p2757_p9 = scmp.lt.s32.totalorder %s2755_s2, %s2751_s23 }
 0x3df   : > { %p2753_p3 = pnand %p2752_p1, %p3004_p0  ;;  %p2758_p8 = por %p2757_p9, %p2756_p7 }
 0x3e1   : > { %p2754_p13 = pneg %p2753_p3 }
 0x3e3   : > { %p2759_p5 = pnand %p2758_p8, %p2754_p13 }
 0x429   : > { %v2469_v16 = vpop.permute.xlu2 %2468 }
 0x42a   : > { %v2471_v19 = vunpack.i.h.bf16 %v2469_v16  ;;  %v2470_v20 = vunpack.i.l.bf16 %v2469_v16 }
 0x43d   : > { %v2464_v14 = vpop.permute.xlu1 %2463 }
 0x43e   : > { %v2466_v8 = vunpack.i.h.bf16 %v2464_v14  ;;  %v2465_v15 = vunpack.i.l.bf16 %v2464_v14  ;;  %v2276_v14 = vld [vmem:[#allocation11 + $0x34] sm:$0xf] }
 0x440   : > { %v1281_v17 = vsel %vm918_vm0, %v1169_v45, %v2466_v8  ;;  %v1280_v18 = vsel %vm918_vm0, %v1167_v60, %v2465_v15  ;;  %v2283_v60 = vld [vmem:[#allocation11 + $0x64] sm:$0xf0]  ;;  %v2282_v45 = vld [vmem:[#allocation11 + $0x64] sm:$0xf]  ;;  %v2130_v8 = vor.u32 %v2277_v13, %v2129_v12  ;;  %v2131_v15 = vld [vmem:[#allocation11 + $0x38] sm:$0xf0] }
 0x441   : > { %v1283_v25 = vsel %vm1282_vm2, %v1280_v18, %v2470_v20  ;;  %v1284_v26 = vsel %vm1282_vm2, %v1281_v17, %v2471_v19  ;;  %v2154_v61 = vor.u32 %v2283_v60, %v2153_v59  ;;  %v2158_v62 = vor.u32 %v2282_v45, %v2155_v40  ;;  %v2121_v17 = vld [vmem:[#allocation11 + $0x20] sm:$0xf]  ;;  %v2275_v18 = vld [vmem:[#allocation11 + $0x24] sm:$0xf0]  ;;  %v2274_v19 = vld [vmem:[#allocation11 + $0x24] sm:$0xf] }
 0x442   : > { %v2134_v16 = vor.u32 %v2276_v14, %v2131_v15  ;;  %v2122_v20 = vor.u32 %v2275_v18, %v2121_v17  ;;  %v2297_v12 = vld [vmem:[#allocation13 + $0x58] sm:$0xff]  ;;  %v2288_v13 = vld [vmem:[#allocation13 + $0x10] sm:$0xff]  ;;  %v2286_v15 = vld [vmem:[#allocation13] sm:$0xff] }
 0x443   : > { %1536 = vmatpush.bf16.msrb.mxu2 %v2154_v61  ;;  %1550 = vmatpush.bf16.msra.mxu3 %v2158_v62  ;;  %v2296_v14 = vld [vmem:[#allocation13 + $0x50] sm:$0xff]  ;;  %v1449_v17 = vld [vmem:[%s3281_s9] sm:$0x3] }
 0x447   : > { %1537 = vmatpush.bf16.msrb.mxu2 %v2146_v3  ;;  %1551 = vmatpush.bf16.msra.mxu3 %v2150_v6 }
 0x44a   : > { %v2474_v21 = vpop.permute.xlu1 %2473 }
 0x44b   : > { %v2476_v22 = vunpack.i.h.bf16 %v2474_v21  ;;  %v2475_v23 = vunpack.i.l.bf16 %v2474_v21  ;;  %1538 = vmatpush.bf16.msrb.mxu2 %v2138_v9  ;;  %1552 = vmatpush.bf16.msra.mxu3 %v2142_v11  ;;  %v2123_v21 = vld [vmem:[#allocation11 + $0x28] sm:$0xf0] }
 0x44d   : > { %v1286_v27 = vsel %vm1285_vm3, %v1283_v25, %v2475_v23  ;;  %v1287_v51 = vsel %vm1285_vm3, %v1284_v26, %v2476_v22  ;;  %v2126_v22 = vor.u32 %v2274_v19, %v2123_v21  ;;  %v2113_v23 = vld [vmem:[#allocation11 + $0x10] sm:$0xf]  ;;  %v2273_v25 = vld [vmem:[#allocation11 + $0x14] sm:$0xf0]  ;;  %v2272_v26 = vld [vmem:[#allocation11 + $0x14] sm:$0xf] }
 0x44e   : > { %v1288_v28 = vpack.c.bf16 %v1287_v51, %v1286_v27  ;;  %v2114_v27 = vor.u32 %v2273_v25, %v2113_v23  ;;  %v2115_v51 = vld [vmem:[#allocation11 + $0x18] sm:$0xf0]  ;;  %v1452_v21 = vperm.slane %v1449_v17, 1 }
 0x44f   : > { %1539 = vmatpush.bf16.msrb.mxu2 %v2130_v8  ;;  %1553 = vmatpush.bf16.msra.mxu3 %v2134_v16  ;;  %v2295_v8 = vld [vmem:[#allocation13 + $0x48] sm:$0xff]  ;;  %v2294_v16 = vld [vmem:[#allocation13 + $0x40] sm:$0xff] }
 0x450   : > { %1365 = vmatmul.bf16.vlgmr.msrb.gmra.mxu1 %v1288_v28  ;;  %v2105_v28 = vld [vmem:[#allocation11] sm:$0xf] }
 0x453   : > { %1540 = vmatpush.bf16.msrb.mxu2 %v2122_v20  ;;  %1554 = vmatpush.bf16.msra.mxu3 %v2126_v22  ;;  %v1451_v20 = vperm.slane %v1449_v17, 0 }
 0x457   : > { %1541 = vmatpush.bf16.msrb.mxu2 %v2114_v27 }
 0x4cd   : > { %v1366_v30 = vpop.f32.mrf.mxu1 }
 0x4ce   : > { %v1367_v31 = vadd.f32 %v2477_v29, %v1366_v30 }
 0x4d0   : > { %v1371_v24 = vadd.f32 %v1367_v31, %v3095_v47  ;;  %v2118_v31 = vor.u32 %v2272_v26, %v2115_v51 }
 0x4d2   : > { %1373 = vadd.xlane.f32.xlu2 %v1371_v24  ;;  %1555 = vmatpush.bf16.msra.mxu3 %v2118_v31 }
 0x4d5   : > { %v1368_v32 = vpop.f32.mrf.mxu1 }
 0x4d6   : > { %v1369_v33 = vadd.f32 %v2477_v29, %v1368_v32  ;;  %v2271_v29 = vld [vmem:[#allocation11 + $0x4] sm:$0xf0]  ;;  %v2107_v32 = vld [vmem:[#allocation11 + $0x8] sm:$0xf0] }
 0x4d8   : > { %v1372_v34 = vadd.f32 %v1369_v33, %v3099_v48 }
 0x4da   : > { %1375 = vadd.xlane.f32.xlu1 %v1372_v34 }
 0x545   : > { %v1374_v43 = vpop.xlane.xlu2 %1373 }
 0x546   : > { %v1384_v44 = vmul.f32 %v3200_v36, %v1374_v43  ;;  %v2292_v43 = vld [vmem:[#allocation13 + $0x30] sm:$0xff] }
 0x547   : > { %1702 = vmatpush.bf16.msrb.mxu0 %v2292_v43 }
 0x548   : > { %v3203_v47 = vsub.f32 %v1371_v24, %v1384_v44  ;;  %v2270_v24 = vld [vmem:[#allocation11 + $0x4] sm:$0xf]  ;;  %v2300_v44 = vld [vmem:[#allocation13 + $0x70] sm:$0xff] }
 0x549   : > { %v2110_v35 = vor.u32 %v2270_v24, %v2107_v32  ;;  %1716 = vmatpush.bf16.msra.mxu1 %v2300_v44 }
 0x54a   : > { %v1388_v46 = vmul.f32 %v3203_v47, %v3203_v47 }
 0x54b   : > { %1556 = vmatpush.bf16.msra.mxu3 %v2110_v35 }
 0x54c   : > { %1390 = vadd.xlane.f32.xlu0 %v1388_v46 }
 0x54d   : > { %v1376_v48 = vpop.xlane.xlu1 %1375  ;;  %1717 = vmatpush.bf16.msra.mxu1 %v2299_v54 }
 0x54e   : > { %v1385_v49 = vmul.f32 %v3200_v36, %v1376_v48 }
 0x550   : > { %v3208_v52 = vsub.f32 %v1372_v34, %v1385_v49  ;;  %v2106_v34 = vor.u32 %v2271_v29, %v2105_v28 }
 0x551   : > { %1718 = vmatpush.bf16.msra.mxu1 %v2298_v50 }
 0x552   : > { %v1389_v53 = vmul.f32 %v3208_v52, %v3208_v52  ;;  %1542 = vmatpush.bf16.msrb.mxu2 %v2106_v34 }
 0x554   : > { %1392 = vadd.xlane.f32.xlu2 %v1389_v53  ;;  %v2291_v53 = vld [vmem:[#allocation13 + $0x28] sm:$0xff] }
 0x555   : > { %1703 = vmatpush.bf16.msrb.mxu0 %v2291_v53  ;;  %1719 = vmatpush.bf16.msra.mxu1 %v2297_v12 }
 0x559   : > { %1704 = vmatpush.bf16.msrb.mxu0 %v2290_v57  ;;  %1720 = vmatpush.bf16.msra.mxu1 %v2296_v14 }
 0x55d   : > { %1721 = vmatpush.bf16.msra.mxu1 %v2295_v8 }
 0x561   : > { %1722 = vmatpush.bf16.msra.mxu1 %v2294_v16 }
 0x5bf   : > { %v1391_v30 = vpop.xlane.xlu0 %1390 }
 0x5c0   : > { %v1394_v33 = vmul.f32 %v1391_v30, %v3200_v36 }
 0x5c2   : > { %v1396_v37 = vadd.f32 1e-05, %v1394_v33  ;;  %v2480_v33 = vld [vmem:[%s3283_s11] ss:$0 sm:$0xff] }
 0x5c4   : > { %2517 = vrsqrt.f32 %v1396_v37  ;;  %vm1404_vm6 = vweird.f32 %v1396_v37 }
 0x5c7   : > { %v1393_v41 = vpop.xlane.xlu2 %1392 }
 0x5c8   : > { %v1395_v42 = vmul.f32 %v1393_v41, %v3200_v36 }
 0x5ca   : > { %v2518_v46 = vpop.eup %2517  ;;  %v1397_v48 = vadd.f32 1e-05, %v1395_v42 }
 0x5cb   : > { %v1399_v49 = vmul.f32 %v2518_v46, %v1396_v37  ;;  %vm1405_vm5 = vweird.f32 %v2518_v46 }
 0x5cc   : > { %2519 = vrsqrt.f32 %v1397_v48  ;;  %vm1406_vm7 = vmor %vm1404_vm6, %vm1405_vm5  ;;  %vm1414_vm9 = vweird.f32 %v1397_v48 }
 0x5cd   : > { %v1400_v55 = vmul.f32 %v2518_v46, %v1399_v49 }
 0x5cf   : > { %v1401_v56 = vmul.f32 0.5, %v1400_v55 }
 0x5d1   : > { %v1402_v58 = vsub.f32 1.5, %v1401_v56 }
 0x5d2   : > { %v2520_v59 = vpop.eup %2519 }
 0x5d3   : > { %v1403_v60 = vmul.f32 %v2518_v46, %v1402_v58  ;;  %v1409_v45 = vmul.f32 %v2520_v59, %v1397_v48  ;;  %vm1415_vm8 = vweird.f32 %v2520_v59 }
 0x5d4   : > { %vm1416_vm10 = vmor %vm1414_vm9, %vm1415_vm8 }
 0x5d5   : > { %v1410_v61 = vmul.f32 %v2520_v59, %v1409_v45  ;;  %v1407_v40 = vsel %vm1406_vm7, %v2518_v46, %v1403_v60 }
 0x5d6   : > { %v1418_v0 = vmul.f32 %v1407_v40, %v3203_v47  ;;  %v2289_v47 = vld [vmem:[#allocation13 + $0x18] sm:$0xff] }
 0x5d7   : > { %v1411_v62 = vmul.f32 0.5, %v1410_v61  ;;  %1705 = vmatpush.bf16.msrb.mxu0 %v2289_v47 }
 0x5d8   : > { %v1424_v2 = vmul.f32 %v2478_v1, %v1418_v0 }
 0x5d9   : > { %v1412_v63 = vsub.f32 1.5, %v1411_v62 }
 0x5da   : > { %v1430_v9 = vadd.f32 %v2479_v5, %v1424_v2 }
 0x5db   : > { %v1413_v3 = vmul.f32 %v2520_v59, %v1412_v63  ;;  %1706 = vmatpush.bf16.msrb.mxu0 %v2288_v13 }
 0x5dd   : > { %v1417_v4 = vsel %vm1416_vm10, %v2520_v59, %v1413_v3 }
 0x5de   : > { %v1419_v6 = vmul.f32 %v1417_v4, %v3208_v52  ;;  %v2287_v52 = vld [vmem:[#allocation13 + $0x8] sm:$0xff] }
 0x5df   : > { %1707 = vmatpush.bf16.msrb.mxu0 %v2287_v52 }
 0x5e0   : > { %v1425_v7 = vmul.f32 %v2478_v1, %v1419_v6 }
 0x5e2   : > { %v1431_v10 = vadd.f32 %v2479_v5, %v1425_v7  ;;  %v2481_v5 = vld [vmem:[%s3322_s25] ss:$0 sm:$0xff] }
 0x5e3   : > { %1708 = vmatpush.bf16.msrb.mxu0 %v2286_v15 }
 0x5e4   : > { %v1432_v11 = vpack.c.bf16 %v1431_v10, %v1430_v9 }
 0x5e6   : > { %1543 = vmatmul.bf16.vlgmr.msrb.gmra.mxu2 %v1432_v11  ;;  %1557 = vmatmul.bf16.vlgmr.msra.gmra.mxu3 %v1432_v11 }
 0x669   : > { %v1544_v18 = vpop.f32.mrf.mxu2  ;;  %v1558_v19 = vpop.f32.mrf.mxu3 }
 0x66a   : > { %v1545_v22 = vadd.f32 %v1544_v18, %v1451_v20  ;;  %v1559_v23 = vadd.f32 %v1558_v19, %v1452_v21 }
 0x66c   : > { %v1563_v28 = vmax.f32 %v1545_v22, 0.0  ;;  %v1564_v29 = vmax.f32 %v1559_v23, 0.0 }
 0x671   : > { %v1546_v25 = vpop.f32.mrf.mxu2  ;;  %v1560_v26 = vpop.f32.mrf.mxu3 }
 0x672   : > { %v1547_v27 = vadd.f32 %v1546_v25, %v1451_v20  ;;  %v1561_v51 = vadd.f32 %v1560_v26, %v1452_v21 }
 0x674   : > { %v1565_v30 = vmax.f32 %v1547_v27, 0.0  ;;  %v1566_v31 = vmax.f32 %v1561_v51, 0.0 }
 0x676   : > { %v1567_v24 = vpack.c.bf16 %v1565_v30, %v1563_v28  ;;  %v1568_v32 = vpack.c.bf16 %v1566_v31, %v1564_v29 }
 0x678   : > { %1709 = vmatmul.bf16.vlgmr.msrb.gmra.mxu0 %v1567_v24  ;;  %1723 = vmatmul.bf16.vlgmr.msra.gmra.mxu1 %v1568_v32 }
 0x6f5   : > { %v1710_v34 = vpop.f32.mrf.mxu0  ;;  %v1724_v35 = vpop.f32.mrf.mxu1 }
 0x6f6   : > { %v1711_v37 = vadd.f32 %v2480_v33, %v1710_v34 }
 0x6f8   : > { %v1725_v38 = vadd.f32 %v1724_v35, %v1711_v37 }
 0x6fa   : > { %v1729_v39 = vadd.f32 %v1725_v38, %v1430_v9  ;;  %v2482_v9 = vld [vmem:[%s3323_s18] ss:$0 sm:$0xff] }
 0x6fc   : > { %1731 = vadd.xlane.f32.xlu1 %v1729_v39 }
 0x6fd   : > { %v1712_v41 = vpop.f32.mrf.mxu0  ;;  %v1726_v43 = vpop.f32.mrf.mxu1 }
 0x6fe   : > { %v1713_v42 = vadd.f32 %v2480_v33, %v1712_v41 }
 0x700   : > { %v1727_v44 = vadd.f32 %v1726_v43, %v1713_v42 }
 0x702   : > { %v1730_v46 = vadd.f32 %v1727_v44, %v1431_v10 }
 0x704   : > { %1733 = vadd.xlane.f32.xlu0 %v1730_v46 }
 0x76f   : > { %v1732_v48 = vpop.xlane.xlu1 %1731 }
 0x770   : > { %v1735_v49 = vmul.f32 %v1732_v48, %v3200_v36 }
 0x772   : > { %v1737_v53 = vsub.f32 %v1729_v39, %v1735_v49 }
 0x774   : > { %v1739_v54 = vmul.f32 %v1737_v53, %v1737_v53 }
 0x776   : > { %1741 = vadd.xlane.f32.xlu2 %v1739_v54 }
 0x777   : > { %v1734_v55 = vpop.xlane.xlu0 %1733 }
 0x778   : > { %v1736_v56 = vmul.f32 %v1734_v55, %v3200_v36 }
 0x77a   : > { %v1738_v57 = vsub.f32 %v1730_v46, %v1736_v56 }
 0x77c   : > { %v1740_v50 = vmul.f32 %v1738_v57, %v1738_v57 }
 0x77e   : > { %1743 = vadd.xlane.f32.xlu1 %v1740_v50 }
 0x7e9   : > { %v1742_v58 = vpop.xlane.xlu2 %1741 }
 0x7ea   : > { %v1745_v59 = vmul.f32 %v1742_v58, %v3200_v36 }
 0x7ec   : > { %v1747_v60 = vadd.f32 1e-05, %v1745_v59 }
 0x7ee   : > { %2521 = vrsqrt.f32 %v1747_v60  ;;  %vm1755_vm12 = vweird.f32 %v1747_v60 }
 0x7f1   : > { %v1744_v45 = vpop.xlane.xlu1 %1743 }
 0x7f2   : > { %v1746_v61 = vmul.f32 %v1744_v45, %v3200_v36 }
 0x7f4   : > { %v2522_v40 = vpop.eup %2521  ;;  %v1748_v62 = vadd.f32 1e-05, %v1746_v61 }
 0x7f5   : > { %v1750_v63 = vmul.f32 %v2522_v40, %v1747_v60  ;;  %vm1756_vm11 = vweird.f32 %v2522_v40 }
 0x7f6   : > { %2523 = vrsqrt.f32 %v1748_v62  ;;  %vm1757_vm13 = vmor %vm1755_vm12, %vm1756_vm11  ;;  %vm1765_vm15 = vweird.f32 %v1748_v62 }
 0x7f7   : > { %v1751_v0 = vmul.f32 %v2522_v40, %v1750_v63 }
 0x7f9   : > { %v1752_v1 = vmul.f32 0.5, %v1751_v0 }
 0x7fb   : > { %v1753_v3 = vsub.f32 1.5, %v1752_v1 }
 0x7fc   : > { %v2524_v4 = vpop.eup %2523 }
 0x7fd   : > { %v1754_v6 = vmul.f32 %v2522_v40, %v1753_v3  ;;  %v1760_v2 = vmul.f32 %v2524_v4, %v1748_v62  ;;  %vm1766_vm14 = vweird.f32 %v2524_v4 }
 0x7fe   : > { %vm1767_vm0 = vmor %vm1765_vm15, %vm1766_vm14 }
 0x7ff   : > { %v1758_v36 = vsel %vm1757_vm13, %v2522_v40, %v1754_v6  ;;  %v1761_v7 = vmul.f32 %v2524_v4, %v1760_v2 }
 0x800   : > { %v1769_v10 = vmul.f32 %v1758_v36, %v1737_v53 }
 0x801   : > { %v1762_v11 = vmul.f32 0.5, %v1761_v7 }
 0x802   : > { %v1775_v47 = vmul.f32 %v2481_v5, %v1769_v10 }
 0x803   : > { %v1763_v12 = vsub.f32 1.5, %v1762_v11 }
 0x804   : > { %v1781_v13 = vadd.f32 %v2482_v9, %v1775_v47 }
 0x805   : > { %v1764_v14 = vmul.f32 %v2524_v4, %v1763_v12 }
 0x806   : > { %1783 = vst [vmem:[%s609_s28] sm:$0xff] %v1781_v13 }
 0x807   : > { %v1768_v52 = vsel %vm1767_vm0, %v2524_v4, %v1764_v14 }
 0x808   : > { %v1770_v8 = vmul.f32 %v1768_v52, %v1738_v57 }
 0x80a   : > { %v1776_v15 = vmul.f32 %v2481_v5, %v1770_v8 }
 0x80c   : > { %v1782_v16 = vadd.f32 %v2482_v9, %v1776_v15 }
 0x80e   : > { %1784 = vst [vmem:[%s609_s28 + $0x8] sm:$0xff] %v1782_v16 }
 0x80f   : > { %2762 = shalt.err (!%p2759_p5)
}
 0x810   : > { %s2834_s4 = smov 128   ;;  %s2835_s24 = smov 8  }
 0x811   : > { %2327 = dma.vmem_to_hbm [thread:$0]  (%p3004_p0), %s1799_s22, 256, %s1801_s10, %s1786_s20, %s2834_s4, %s2834_s4, %s2835_s24  }
 0x812 PF: > { %s1815_s27 = sand.u32 1, %s2805_s29   ;;  %p3325_p10 = scmp.ge.s32.totalorder %s2817_s16, 2 }
 0x813   : > { %s1816_s18 = scalar_lea.sflag [#allocation4], %s1815_s27 }
 0x814   : > { %p2353_p11 = pnand %p3325_p10, %p3010_p6 }
 0x816   : > { %p2354_p12 = pneg %p2353_p11 }
 0x818   : > { %2800 = dma.done.wait (%p2354_p12), %s1816_s18, 256  }
 0x819   : > { %2802 = vsyncadd (%p2354_p12), %s1816_s18, 4294967040  ;;  %s3326_s16 = sld [smem:[#allocation22_spill]]  ;;  %s3329_s29 = smov %s2809_s30 }
 0x81a   : > { %s3327_s15 = sld [smem:[#allocation21_spill]] }
 0x81b   : > { %s3328_s13 = sld [smem:[#allocation23_spill]] }
 0x81f   : > { %p32_p2 = scmp.ge.s32.totalorder %s3326_s16, 4  }
 0x820   : > { %s3330_s30 = smov %s3327_s15 }
 0x821   : > { %s3331_s15 = smov %s3328_s13  ;;  %34 = sbr.rel (!%p32_p2) target bundleno = 19 (0x13), region = 154 }
 0x826   :  { %1822 = vsyncpa [#allocation3], 1 }
 0x827   :  { %1824 = vsyncpa [#allocation3 + $0x1], 1 }
 0x828   :  { %1825 = vsyncpa [#allocation6], 1 }
 0x829   :  { %1827 = vsyncpa [#allocation6 + $0x1], 1 }
 0x82a   :  { %1828 = vsyncpa [#allocation9], 1 }
 0x82b   :  { %1829 = vsyncpa [#allocation12], 1 }
 0x82c   :  { %1830 = vsyncpa [#allocation4], 1 }
 0x82d   :  { %1832 = vsyncpa [#allocation4 + $0x1], 1 }

</bundles_post_ra>
